<compile_context>
chip_gen: v7x
topology: tpu7x:2x2x1
jax: 0.10.0
libtpu: 0.0.40
codegen_flags: <defaults>
</compile_context>

<pallas_src>
import functools

import jax
import jax.numpy as jnp
from jax.experimental import pallas as pl
from jax.experimental.pallas import tpu as pltpu


ATTN_KEYS = ('wqkv', 'bqkv', 'wo_heads', 'bo', 'ln1_g', 'ln1_b')
FFN_KEYS = ('w1', 'b1', 'w2', 'b2', 'ln2_g', 'ln2_b')


@functools.lru_cache(maxsize=1)
def _vmem_limit_bytes():
    """Generation-aware VMEM budget: capacity minus headroom.

    ~112 MiB on 128-MiB parts (v5e/v6e), ~48 MiB on v7x's 64 MiB.
    """
    try:
        cap = int(pltpu.get_tpu_info().vmem_capacity_bytes)
    except Exception:
        cap = 64 * 1024 * 1024
    return max(cap - 16 * 1024 * 1024, 32 * 1024 * 1024)


def _pick_tile(n, candidates):
    for c in candidates:
        if n % c == 0:
            return c
    return n  # falls back to the full dim (always a legal block shape)


def _pick_row_tile(n, candidates=(1024, 512, 256, 128, 64, 32, 16, 8)):
    # Prefer the largest tile that still leaves >= 2 grid steps (v7x has two
    # TensorCores per chip); otherwise the largest divisor / full dim.
    for c in candidates:
        if n % c == 0 and n // c >= 2:
            return c
    return _pick_tile(n, candidates)


def _layernorm(x, g, b, eps=1e-5):
    # Statistics kept in f32 (v5e has no bf16 VPU/EUP path).
    mu = jnp.mean(x, axis=-1, keepdims=True)
    c = x - mu
    var = jnp.mean(c * c, axis=-1, keepdims=True)
    return c * jax.lax.rsqrt(var + eps) * g + b


def _linear(x_bf16, w, b):
    # y = x @ W.T + b with W: (out, in); contraction over the last dim of
    # BOTH operands (no weight transpose), bf16 MXU operands, f32 accumulation.
    return jax.lax.dot_general(
        x_bf16, w, dimension_numbers=(((1,), (1,)), ((), ())),
        preferred_element_type=jnp.float32) + b


# --------------------------------------------------------------------------
# Attention (+ residual + LayerNorm1) kernel: one batch element per grid step.
# --------------------------------------------------------------------------
def attention_layer_kernel(x_ref, wqkv_ref, bqkv_ref, wo_heads_ref, bo_ref,
                           ln1_g_ref, ln1_b_ref, o_ref, *, num_heads):
    _, S, H = x_ref.shape
    hd = H // num_heads

    x = x_ref[0].astype(jnp.float32)                        # (S, H)
    x16 = x.astype(jnp.bfloat16)                            # cast once for MXU

    # Fused QKV projection, produced TRANSPOSED: qkvT = Wqkv @ x^T -> (3H, S).
    # One wide MXU call (M = 3H); per-head extraction below is then an aligned
    # sublane slice (no lane relayout copies, no stack/concat).
    # 1/sqrt(head_dim) is already folded into the q rows of wqkv/bqkv.
    qkvT = jax.lax.dot_general(
        wqkv_ref[...], x16,
        dimension_numbers=(((1,), (1,)), ((), ())),
        preferred_element_type=jnp.float32) + bqkv_ref[...]  # (3H, S)
    qkvT = qkvT.astype(jnp.bfloat16)

    attn = jnp.zeros((S, H), jnp.float32)
    for h in range(num_heads):                               # static unroll
        qT = qkvT[h * hd:(h + 1) * hd, :]                    # (hd, S) sublane
        kT = qkvT[H + h * hd:H + (h + 1) * hd, :]            # slices: aligned,
        vT = qkvT[2 * H + h * hd:2 * H + (h + 1) * hd, :]    # no lane relayout

        # scores = q @ k^T ; only one (S, S) tile is live at a time.
        s = jnp.dot(qT.T, kT, preferred_element_type=jnp.float32)
        s = s - jnp.max(s, axis=-1, keepdims=True)
        p = jnp.exp(s)
        p = p * pl.reciprocal(jnp.sum(p, axis=-1, keepdims=True), approx=True)

        # ctx^T = v^T @ p^T  (contract the key axis of both operands).
        ctxT = jax.lax.dot_general(
            vT, p.astype(jnp.bfloat16),
            dimension_numbers=(((1,), (1,)), ((), ())),
            preferred_element_type=jnp.float32)               # (hd, S)

        # Head merge folded into the out-projection: attn += ctx_h @ Wo_h^T.
        attn += jax.lax.dot_general(
            ctxT.astype(jnp.bfloat16).T, wo_heads_ref[h],
            dimension_numbers=(((1,), (1,)), ((), ())),
            preferred_element_type=jnp.float32)               # (S, H)

    attn = attn + bo_ref[...]
    # residual + LayerNorm1 (dropout = identity / eval semantics)
    x1 = _layernorm(x + attn, ln1_g_ref[...], ln1_b_ref[...])
    o_ref[0] = x1.astype(o_ref.dtype)


def attention_block(x, lp, num_heads):
    B, S, H = x.shape
    weight_args = [lp[k] for k in ATTN_KEYS]

    in_specs = [pl.BlockSpec((1, S, H), lambda i: (i, 0, 0))]
    # Params are constant across the grid: whole-array VMEM residents
    # (no per-step DMA, no double buffering of constant blocks).
    in_specs += [pl.BlockSpec(memory_space=pltpu.MemorySpace.VMEM)
                 for _ in weight_args]

    flops = B * (2 * S * H * 3 * H + 4 * S * S * H + 2 * S * H * H)
    transcendentals = B * (num_heads * S * S + S)
    w_bytes = sum(int(w.size) * w.dtype.itemsize for w in weight_args)
    bytes_accessed = 2 * B * S * H * 4 + w_bytes

    return pl.pallas_call(
        functools.partial(attention_layer_kernel, num_heads=num_heads),
        out_shape=jax.ShapeDtypeStruct((B, S, H), x.dtype),
        grid_spec=pltpu.PrefetchScalarGridSpec(
            num_scalar_prefetch=0,
            grid=(B,),
            in_specs=in_specs,
            out_specs=pl.BlockSpec((1, S, H), lambda i: (i, 0, 0))),
        compiler_params=pltpu.CompilerParams(
            dimension_semantics=("parallel",),
            vmem_limit_bytes=_vmem_limit_bytes()),
        cost_estimate=pl.CostEstimate(flops=flops,
                                      transcendentals=transcendentals,
                                      bytes_accessed=bytes_accessed),
    )(x, *weight_args)


# --------------------------------------------------------------------------
# FeedForward (+ residual + LayerNorm2) kernel: row-tiled over (B*S, H).
# --------------------------------------------------------------------------
def ffn_layer_kernel(x_ref, w1_ref, b1_ref, w2_ref, b2_ref,
                     ln2_g_ref, ln2_b_ref, o_ref):
    x = x_ref[...].astype(jnp.float32)                         # (TM, H)
    h1 = jnp.maximum(
        _linear(x.astype(jnp.bfloat16), w1_ref[...], b1_ref[...]), 0.0)
    ff = _linear(h1.astype(jnp.bfloat16), w2_ref[...], b2_ref[...])
    # residual + LayerNorm2 (dropout = identity / eval semantics)
    o_ref[...] = _layernorm(x + ff, ln2_g_ref[...], ln2_b_ref[...]
                            ).astype(o_ref.dtype)


def ffn_block(x, lp):
    B, S, H = x.shape
    BS = B * S
    I = lp['w1'].shape[0]
    x2d = x.reshape(BS, H)
    TM = _pick_row_tile(BS)
    weight_args = [lp[k] for k in FFN_KEYS]

    in_specs = [pl.BlockSpec((TM, H), lambda i: (i, 0))]
    # TODO(synk): at very large intermediate sizes on v7x, stream w1/w2 via a
    #             BlockSpec tiled over I instead of whole-array residency.
    in_specs += [pl.BlockSpec(memory_space=pltpu.MemorySpace.VMEM)
                 for _ in weight_args]

    flops = 4 * BS * H * I
    w_bytes = sum(int(w.size) * w.dtype.itemsize for w in weight_args)
    bytes_accessed = 2 * BS * H * 4 + w_bytes

    out = pl.pallas_call(
        ffn_layer_kernel,
        out_shape=jax.ShapeDtypeStruct((BS, H), x.dtype),
        grid_spec=pltpu.PrefetchScalarGridSpec(
            num_scalar_prefetch=0,
            grid=(BS // TM,),
            in_specs=in_specs,
            out_specs=pl.BlockSpec((TM, H), lambda i: (i, 0))),
        compiler_params=pltpu.CompilerParams(
            dimension_semantics=("parallel",),
            vmem_limit_bytes=_vmem_limit_bytes()),
        cost_estimate=pl.CostEstimate(flops=flops, transcendentals=BS,
                                      bytes_accessed=bytes_accessed),
    )(x2d, *weight_args)
    return out.reshape(B, S, H)


# --------------------------------------------------------------------------
# MLM head: (B*S, H) @ (V, H)^T, vocab-outer grid so the weight streams once.
# --------------------------------------------------------------------------
def mlm_head_kernel(x_ref, w_ref, b_ref, o_ref):
    o_ref[...] = _linear(x_ref[...].astype(jnp.bfloat16), w_ref[...],
                         b_ref[...]).astype(o_ref.dtype)


def mlm_head(x, w, b):
    B, S, H = x.shape
    V = w.shape[0]
    BS = B * S
    x2d = x.reshape(BS, H)

    # Real vocab sizes (e.g. 30522) are not multiples of 128: pad the vocab
    # axis so the weight tiles cleanly; padded logits are sliced off after.
    V_pad = ((V + 255) // 256) * 256
    if V_pad != V:
        w = jnp.pad(w, ((0, V_pad - V), (0, 0)))
        b = jnp.pad(b, ((0, 0), (0, V_pad - V)))

    tv_cap = 2048 if _vmem_limit_bytes() >= 96 * 1024 * 1024 else 1024
    TV = _pick_tile(V_pad, tuple(c for c in (2048, 1024, 512, 256)
                                 if c <= tv_cap))
    TM = _pick_tile(BS, (512, 256, 128, 64, 32, 16, 8))

    flops = 2 * BS * H * V_pad
    bytes_accessed = BS * H * 4 + V_pad * H * 2 + V_pad * 4 + BS * V_pad * 4

    # Vocab is the OUTER grid axis: the (TV, H) weight block index is constant
    # across the inner row loop, so the big vocab weight is streamed from HBM
    # exactly once; only the small (TM, H) activation tile is re-fetched.
    out = pl.pallas_call(
        mlm_head_kernel,
        out_shape=jax.ShapeDtypeStruct((BS, V_pad), x.dtype),
        grid_spec=pltpu.PrefetchScalarGridSpec(
            num_scalar_prefetch=0,
            grid=(V_pad // TV, BS // TM),
            in_specs=[pl.BlockSpec((TM, H), lambda j, i: (i, 0)),
                      pl.BlockSpec((TV, H), lambda j, i: (j, 0)),
                      pl.BlockSpec((1, TV), lambda j, i: (0, j))],
            out_specs=pl.BlockSpec((TM, TV), lambda j, i: (i, j))),
        compiler_params=pltpu.CompilerParams(
            dimension_semantics=("parallel", "parallel"),
            vmem_limit_bytes=_vmem_limit_bytes()),
        cost_estimate=pl.CostEstimate(flops=flops, transcendentals=0,
                                      bytes_accessed=bytes_accessed),
    )(x2d, w, b)
    if V_pad != V:
        out = out[:, :V]
    return out.reshape(B, S, V)


# --------------------------------------------------------------------------
# Parameters & forward pass
# --------------------------------------------------------------------------
def init_params(key, vocab_size, hidden, num_heads, num_layers, intermediate,
                max_pos):
    keys = jax.random.split(key, 3 + num_layers)

    def nrm(k, shape, scale=0.02):
        return scale * jax.random.normal(k, shape, dtype=jnp.float32)

    H, I = hidden, intermediate
    hd = H // num_heads
    qscale = 1.0 / (hd ** 0.5)

    # Matmul weights stored bf16 (MXU-native, half the DMA/VMEM bytes);
    # embeddings, biases and layernorm params stay f32.
    params = {
        'tok_emb': nrm(keys[0], (vocab_size, H)),
        'pos_emb': nrm(keys[1], (max_pos, H)),
        'mlm_w': nrm(keys[2], (vocab_size, H)).astype(jnp.bfloat16),
        'mlm_b': jnp.zeros((1, vocab_size), jnp.float32),
        'layers': [],
    }
    for l in range(num_layers):
        lk = jax.random.split(keys[3 + l], 6)
        wq, wk, wv = nrm(lk[0], (H, H)), nrm(lk[1], (H, H)), nrm(lk[2], (H, H))
        wo = nrm(lk[3], (H, H))
        # Fused QKV weight/bias with 1/sqrt(head_dim) folded into the q rows;
        # bias stored (3H, 1) so it broadcasts over the transposed projection.
        wqkv = jnp.concatenate([wq * qscale, wk, wv], axis=0
                               ).astype(jnp.bfloat16)
        bqkv = jnp.zeros((3 * H, 1), jnp.float32)
        # Out-projection pre-split per head: wo_heads[h] = wo[:, h*hd:(h+1)*hd]
        # so the head merge is an MXU accumulation, not a concat.
        wo_heads = jnp.stack(
            [wo[:, h * hd:(h + 1) * hd] for h in range(num_heads)],
            axis=0).astype(jnp.bfloat16)
        layer = {
            'wqkv': wqkv, 'bqkv': bqkv, 'wo_heads': wo_heads,
            'bo': jnp.zeros((1, H), jnp.float32),
            'ln1_g': jnp.ones((1, H), jnp.float32),
            'ln1_b': jnp.zeros((1, H), jnp.float32),
            'w1': nrm(lk[4], (I, H)).astype(jnp.bfloat16),
            'b1': jnp.zeros((1, I), jnp.float32),
            'w2': nrm(lk[5], (H, I)).astype(jnp.bfloat16),
            'b2': jnp.zeros((1, H), jnp.float32),
            'ln2_g': jnp.ones((1, H), jnp.float32),
            'ln2_b': jnp.zeros((1, H), jnp.float32),
        }
        params['layers'].append(layer)
    return params


def simple_bert_forward(input_ids, params, num_heads):
    B, S = input_ids.shape
    # Embedding gathers kept in plain JAX (glue; not the hot path).
    tok = jnp.take(params['tok_emb'], input_ids, axis=0)      # (B, S, H)
    pos = params['pos_emb'][:S][None, :, :]                   # (1, S, H)
    x = tok + pos
    for lp in params['layers']:
        x = attention_block(x, lp, num_heads)
        x = ffn_block(x, lp)
    return mlm_head(x, params['mlm_w'], params['mlm_b'])


if __name__ == "__main__":
    # Small shapes consistent with the module (scaled-down vocab / layers).
    vocab_size, hidden, num_heads, num_layers, intermediate = 512, 128, 4, 2, 512
    max_pos, B, S = 64, 2, 16

    key = jax.random.PRNGKey(0)
    pkey, ikey = jax.random.split(key)
    params = init_params(pkey, vocab_size, hidden, num_heads, num_layers,
                         intermediate, max_pos)
    input_ids = jax.random.randint(ikey, (B, S), 0, vocab_size, dtype=jnp.int32)

    logits = simple_bert_forward(input_ids, params, num_heads)
    jax.block_until_ready(logits)
    assert logits.shape == (B, S, vocab_size)
    assert logits.dtype == jnp.float32
    print("KERNEL_OK")
</pallas_src>

<mosaic_0001>
module attributes {stable_mosaic.version = 11 : i64} {
  func.func @attention_layer_kernel(%arg0: i32, %arg1: memref<1x16x128xf32, #tpu.memory_space<vmem>>, %arg2: memref<384x128xbf16, #tpu.memory_space<vmem>>, %arg3: memref<384x1xf32, #tpu.memory_space<vmem>>, %arg4: memref<4x128x32xbf16, #tpu.memory_space<vmem>>, %arg5: memref<1x128xf32, #tpu.memory_space<vmem>>, %arg6: memref<1x128xf32, #tpu.memory_space<vmem>>, %arg7: memref<1x128xf32, #tpu.memory_space<vmem>>, %arg8: memref<1x16x128xf32, #tpu.memory_space<vmem>>) attributes {dimension_semantics = [#tpu.dimension_semantics<parallel>], iteration_bounds = array<i64: 2>, scalar_prefetch = 0 : i64, scratch_operands = 0 : i64, tpu.core_type = #tpu.core_type<tc>, window_params = [{transform_indices = @transform_0, window_bounds = array<i64: 1, 16, 128>}, {pipeline_mode = #tpu.pipeline_mode<synchronous>, transform_indices = @transform_1, window_bounds = array<i64: 384, 128>}, {pipeline_mode = #tpu.pipeline_mode<synchronous>, transform_indices = @transform_2, window_bounds = array<i64: 384, 1>}, {pipeline_mode = #tpu.pipeline_mode<synchronous>, transform_indices = @transform_3, window_bounds = array<i64: 4, 128, 32>}, {pipeline_mode = #tpu.pipeline_mode<synchronous>, transform_indices = @transform_4, window_bounds = array<i64: 1, 128>}, {pipeline_mode = #tpu.pipeline_mode<synchronous>, transform_indices = @transform_5, window_bounds = array<i64: 1, 128>}, {pipeline_mode = #tpu.pipeline_mode<synchronous>, transform_indices = @transform_6, window_bounds = array<i64: 1, 128>}, {transform_indices = @transform_7, window_bounds = array<i64: 1, 16, 128>}]} {
    %c0 = arith.constant 0 : index
    %c0_0 = arith.constant 0 : index
    %c0_1 = arith.constant 0 : index
    %0 = vector.load %arg1[%c0, %c0_0, %c0_1] : memref<1x16x128xf32, #tpu.memory_space<vmem>>, vector<1x16x128xf32>
    %1 = vector.shape_cast %0 : vector<1x16x128xf32> to vector<16x128xf32>
    %2 = arith.truncf %1 : vector<16x128xf32> to vector<16x128xbf16>
    %c0_2 = arith.constant 0 : index
    %c0_3 = arith.constant 0 : index
    %3 = vector.load %arg2[%c0_2, %c0_3] : memref<384x128xbf16, #tpu.memory_space<vmem>>, vector<384x128xbf16>
    %cst = arith.constant dense<0.000000e+00> : vector<384x16xf32>
    %4 = tpu.matmul %3, %2, %cst {dimension_numbers = #tpu.dot_dimension_numbers<[1], [1], [0], [0], [0, 0, 1, 0], [], []>} : vector<384x128xbf16>, vector<16x128xbf16>, vector<384x16xf32> -> vector<384x16xf32>
    %c0_4 = arith.constant 0 : index
    %c0_5 = arith.constant 0 : index
    %5 = vector.load %arg3[%c0_4, %c0_5] : memref<384x1xf32, #tpu.memory_space<vmem>>, vector<384x1xf32>
    %6 = vector.broadcast %5 : vector<384x1xf32> to vector<384x16xf32>
    %7 = arith.addf %4, %6 : vector<384x16xf32>
    %8 = arith.truncf %7 : vector<384x16xf32> to vector<384x16xbf16>
    %cst_6 = arith.constant 0.000000e+00 : f32
    %9 = vector.broadcast %cst_6 : f32 to vector<16x128xf32>
    %10 = vector.extract_strided_slice %8 {offsets = [0, 0], sizes = [32, 16], strides = [1, 1]} : vector<384x16xbf16> to vector<32x16xbf16>
    %11 = vector.extract_strided_slice %8 {offsets = [128, 0], sizes = [32, 16], strides = [1, 1]} : vector<384x16xbf16> to vector<32x16xbf16>
    %12 = vector.extract_strided_slice %8 {offsets = [256, 0], sizes = [32, 16], strides = [1, 1]} : vector<384x16xbf16> to vector<32x16xbf16>
    %13 = tpu.transpose %10, [1, 0] : vector<32x16xbf16> -> vector<16x32xbf16>
    %cst_7 = arith.constant dense<0.000000e+00> : vector<16x16xf32>
    %14 = tpu.matmul %13, %11, %cst_7 {dimension_numbers = #tpu.dot_dimension_numbers<[1], [0], [0], [1], [0, 0, 1, 1], [], []>} : vector<16x32xbf16>, vector<32x16xbf16>, vector<16x16xf32> -> vector<16x16xf32>
    %cst_8 = arith.constant dense<0xFF800000> : vector<16xf32>
    %15 = vector.multi_reduction <maximumf>, %14, %cst_8 [1] : vector<16x16xf32> to vector<16xf32>
    %16 = vector.shape_cast %15 : vector<16xf32> to vector<16x1xf32>
    %17 = vector.broadcast %16 : vector<16x1xf32> to vector<16x16xf32>
    %18 = arith.subf %14, %17 : vector<16x16xf32>
    %19 = math.exp %18 : vector<16x16xf32>
    %cst_9 = arith.constant dense<0.000000e+00> : vector<16xf32>
    %20 = vector.multi_reduction <add>, %19, %cst_9 [1] : vector<16x16xf32> to vector<16xf32>
    %21 = vector.shape_cast %20 : vector<16xf32> to vector<16x1xf32>
    %22 = tpu.reciprocal %21 {approx = true} : vector<16x1xf32> -> vector<16x1xf32>
    %23 = vector.broadcast %22 : vector<16x1xf32> to vector<16x16xf32>
    %24 = arith.mulf %19, %23 : vector<16x16xf32>
    %25 = arith.truncf %24 : vector<16x16xf32> to vector<16x16xbf16>
    %cst_10 = arith.constant dense<0.000000e+00> : vector<32x16xf32>
    %26 = tpu.matmul %12, %25, %cst_10 {dimension_numbers = #tpu.dot_dimension_numbers<[1], [1], [0], [0], [0, 0, 1, 0], [], []>} : vector<32x16xbf16>, vector<16x16xbf16>, vector<32x16xf32> -> vector<32x16xf32>
    %27 = arith.truncf %26 : vector<32x16xf32> to vector<32x16xbf16>
    %28 = tpu.transpose %27, [1, 0] : vector<32x16xbf16> -> vector<16x32xbf16>
    %c0_11 = arith.constant 0 : index
    %c0_12 = arith.constant 0 : index
    %c0_13 = arith.constant 0 : index
    %29 = vector.load %arg4[%c0_11, %c0_12, %c0_13] : memref<4x128x32xbf16, #tpu.memory_space<vmem>>, vector<1x128x32xbf16>
    %30 = vector.shape_cast %29 : vector<1x128x32xbf16> to vector<128x32xbf16>
    %cst_14 = arith.constant dense<0.000000e+00> : vector<16x128xf32>
    %31 = tpu.matmul %28, %30, %cst_14 {dimension_numbers = #tpu.dot_dimension_numbers<[1], [1], [0], [0], [0, 0, 1, 0], [], []>} : vector<16x32xbf16>, vector<128x32xbf16>, vector<16x128xf32> -> vector<16x128xf32>
    %32 = arith.addf %9, %31 : vector<16x128xf32>
    %33 = vector.extract_strided_slice %8 {offsets = [32, 0], sizes = [32, 16], strides = [1, 1]} : vector<384x16xbf16> to vector<32x16xbf16>
    %34 = vector.extract_strided_slice %8 {offsets = [160, 0], sizes = [32, 16], strides = [1, 1]} : vector<384x16xbf16> to vector<32x16xbf16>
    %35 = vector.extract_strided_slice %8 {offsets = [288, 0], sizes = [32, 16], strides = [1, 1]} : vector<384x16xbf16> to vector<32x16xbf16>
    %36 = tpu.transpose %33, [1, 0] : vector<32x16xbf16> -> vector<16x32xbf16>
    %cst_15 = arith.constant dense<0.000000e+00> : vector<16x16xf32>
    %37 = tpu.matmul %36, %34, %cst_15 {dimension_numbers = #tpu.dot_dimension_numbers<[1], [0], [0], [1], [0, 0, 1, 1], [], []>} : vector<16x32xbf16>, vector<32x16xbf16>, vector<16x16xf32> -> vector<16x16xf32>
    %cst_16 = arith.constant dense<0xFF800000> : vector<16xf32>
    %38 = vector.multi_reduction <maximumf>, %37, %cst_16 [1] : vector<16x16xf32> to vector<16xf32>
    %39 = vector.shape_cast %38 : vector<16xf32> to vector<16x1xf32>
    %40 = vector.broadcast %39 : vector<16x1xf32> to vector<16x16xf32>
    %41 = arith.subf %37, %40 : vector<16x16xf32>
    %42 = math.exp %41 : vector<16x16xf32>
    %cst_17 = arith.constant dense<0.000000e+00> : vector<16xf32>
    %43 = vector.multi_reduction <add>, %42, %cst_17 [1] : vector<16x16xf32> to vector<16xf32>
    %44 = vector.shape_cast %43 : vector<16xf32> to vector<16x1xf32>
    %45 = tpu.reciprocal %44 {approx = true} : vector<16x1xf32> -> vector<16x1xf32>
    %46 = vector.broadcast %45 : vector<16x1xf32> to vector<16x16xf32>
    %47 = arith.mulf %42, %46 : vector<16x16xf32>
    %48 = arith.truncf %47 : vector<16x16xf32> to vector<16x16xbf16>
    %cst_18 = arith.constant dense<0.000000e+00> : vector<32x16xf32>
    %49 = tpu.matmul %35, %48, %cst_18 {dimension_numbers = #tpu.dot_dimension_numbers<[1], [1], [0], [0], [0, 0, 1, 0], [], []>} : vector<32x16xbf16>, vector<16x16xbf16>, vector<32x16xf32> -> vector<32x16xf32>
    %50 = arith.truncf %49 : vector<32x16xf32> to vector<32x16xbf16>
    %51 = tpu.transpose %50, [1, 0] : vector<32x16xbf16> -> vector<16x32xbf16>
    %c1 = arith.constant 1 : index
    %c0_19 = arith.constant 0 : index
    %c0_20 = arith.constant 0 : index
    %52 = vector.load %arg4[%c1, %c0_19, %c0_20] : memref<4x128x32xbf16, #tpu.memory_space<vmem>>, vector<1x128x32xbf16>
    %53 = vector.shape_cast %52 : vector<1x128x32xbf16> to vector<128x32xbf16>
    %cst_21 = arith.constant dense<0.000000e+00> : vector<16x128xf32>
    %54 = tpu.matmul %51, %53, %cst_21 {dimension_numbers = #tpu.dot_dimension_numbers<[1], [1], [0], [0], [0, 0, 1, 0], [], []>} : vector<16x32xbf16>, vector<128x32xbf16>, vector<16x128xf32> -> vector<16x128xf32>
    %55 = arith.addf %32, %54 : vector<16x128xf32>
    %56 = vector.extract_strided_slice %8 {offsets = [64, 0], sizes = [32, 16], strides = [1, 1]} : vector<384x16xbf16> to vector<32x16xbf16>
    %57 = vector.extract_strided_slice %8 {offsets = [192, 0], sizes = [32, 16], strides = [1, 1]} : vector<384x16xbf16> to vector<32x16xbf16>
    %58 = vector.extract_strided_slice %8 {offsets = [320, 0], sizes = [32, 16], strides = [1, 1]} : vector<384x16xbf16> to vector<32x16xbf16>
    %59 = tpu.transpose %56, [1, 0] : vector<32x16xbf16> -> vector<16x32xbf16>
    %cst_22 = arith.constant dense<0.000000e+00> : vector<16x16xf32>
    %60 = tpu.matmul %59, %57, %cst_22 {dimension_numbers = #tpu.dot_dimension_numbers<[1], [0], [0], [1], [0, 0, 1, 1], [], []>} : vector<16x32xbf16>, vector<32x16xbf16>, vector<16x16xf32> -> vector<16x16xf32>
    %cst_23 = arith.constant dense<0xFF800000> : vector<16xf32>
    %61 = vector.multi_reduction <maximumf>, %60, %cst_23 [1] : vector<16x16xf32> to vector<16xf32>
    %62 = vector.shape_cast %61 : vector<16xf32> to vector<16x1xf32>
    %63 = vector.broadcast %62 : vector<16x1xf32> to vector<16x16xf32>
    %64 = arith.subf %60, %63 : vector<16x16xf32>
    %65 = math.exp %64 : vector<16x16xf32>
    %cst_24 = arith.constant dense<0.000000e+00> : vector<16xf32>
    %66 = vector.multi_reduction <add>, %65, %cst_24 [1] : vector<16x16xf32> to vector<16xf32>
    %67 = vector.shape_cast %66 : vector<16xf32> to vector<16x1xf32>
    %68 = tpu.reciprocal %67 {approx = true} : vector<16x1xf32> -> vector<16x1xf32>
    %69 = vector.broadcast %68 : vector<16x1xf32> to vector<16x16xf32>
    %70 = arith.mulf %65, %69 : vector<16x16xf32>
    %71 = arith.truncf %70 : vector<16x16xf32> to vector<16x16xbf16>
    %cst_25 = arith.constant dense<0.000000e+00> : vector<32x16xf32>
    %72 = tpu.matmul %58, %71, %cst_25 {dimension_numbers = #tpu.dot_dimension_numbers<[1], [1], [0], [0], [0, 0, 1, 0], [], []>} : vector<32x16xbf16>, vector<16x16xbf16>, vector<32x16xf32> -> vector<32x16xf32>
    %73 = arith.truncf %72 : vector<32x16xf32> to vector<32x16xbf16>
    %74 = tpu.transpose %73, [1, 0] : vector<32x16xbf16> -> vector<16x32xbf16>
    %c2 = arith.constant 2 : index
    %c0_26 = arith.constant 0 : index
    %c0_27 = arith.constant 0 : index
    %75 = vector.load %arg4[%c2, %c0_26, %c0_27] : memref<4x128x32xbf16, #tpu.memory_space<vmem>>, vector<1x128x32xbf16>
    %76 = vector.shape_cast %75 : vector<1x128x32xbf16> to vector<128x32xbf16>
    %cst_28 = arith.constant dense<0.000000e+00> : vector<16x128xf32>
    %77 = tpu.matmul %74, %76, %cst_28 {dimension_numbers = #tpu.dot_dimension_numbers<[1], [1], [0], [0], [0, 0, 1, 0], [], []>} : vector<16x32xbf16>, vector<128x32xbf16>, vector<16x128xf32> -> vector<16x128xf32>
    %78 = arith.addf %55, %77 : vector<16x128xf32>
    %79 = vector.extract_strided_slice %8 {offsets = [96, 0], sizes = [32, 16], strides = [1, 1]} : vector<384x16xbf16> to vector<32x16xbf16>
    %80 = vector.extract_strided_slice %8 {offsets = [224, 0], sizes = [32, 16], strides = [1, 1]} : vector<384x16xbf16> to vector<32x16xbf16>
    %81 = vector.extract_strided_slice %8 {offsets = [352, 0], sizes = [32, 16], strides = [1, 1]} : vector<384x16xbf16> to vector<32x16xbf16>
    %82 = tpu.transpose %79, [1, 0] : vector<32x16xbf16> -> vector<16x32xbf16>
    %cst_29 = arith.constant dense<0.000000e+00> : vector<16x16xf32>
    %83 = tpu.matmul %82, %80, %cst_29 {dimension_numbers = #tpu.dot_dimension_numbers<[1], [0], [0], [1], [0, 0, 1, 1], [], []>} : vector<16x32xbf16>, vector<32x16xbf16>, vector<16x16xf32> -> vector<16x16xf32>
    %cst_30 = arith.constant dense<0xFF800000> : vector<16xf32>
    %84 = vector.multi_reduction <maximumf>, %83, %cst_30 [1] : vector<16x16xf32> to vector<16xf32>
    %85 = vector.shape_cast %84 : vector<16xf32> to vector<16x1xf32>
    %86 = vector.broadcast %85 : vector<16x1xf32> to vector<16x16xf32>
    %87 = arith.subf %83, %86 : vector<16x16xf32>
    %88 = math.exp %87 : vector<16x16xf32>
    %cst_31 = arith.constant dense<0.000000e+00> : vector<16xf32>
    %89 = vector.multi_reduction <add>, %88, %cst_31 [1] : vector<16x16xf32> to vector<16xf32>
    %90 = vector.shape_cast %89 : vector<16xf32> to vector<16x1xf32>
    %91 = tpu.reciprocal %90 {approx = true} : vector<16x1xf32> -> vector<16x1xf32>
    %92 = vector.broadcast %91 : vector<16x1xf32> to vector<16x16xf32>
    %93 = arith.mulf %88, %92 : vector<16x16xf32>
    %94 = arith.truncf %93 : vector<16x16xf32> to vector<16x16xbf16>
    %cst_32 = arith.constant dense<0.000000e+00> : vector<32x16xf32>
    %95 = tpu.matmul %81, %94, %cst_32 {dimension_numbers = #tpu.dot_dimension_numbers<[1], [1], [0], [0], [0, 0, 1, 0], [], []>} : vector<32x16xbf16>, vector<16x16xbf16>, vector<32x16xf32> -> vector<32x16xf32>
    %96 = arith.truncf %95 : vector<32x16xf32> to vector<32x16xbf16>
    %97 = tpu.transpose %96, [1, 0] : vector<32x16xbf16> -> vector<16x32xbf16>
    %c3 = arith.constant 3 : index
    %c0_33 = arith.constant 0 : index
    %c0_34 = arith.constant 0 : index
    %98 = vector.load %arg4[%c3, %c0_33, %c0_34] : memref<4x128x32xbf16, #tpu.memory_space<vmem>>, vector<1x128x32xbf16>
    %99 = vector.shape_cast %98 : vector<1x128x32xbf16> to vector<128x32xbf16>
    %cst_35 = arith.constant dense<0.000000e+00> : vector<16x128xf32>
    %100 = tpu.matmul %97, %99, %cst_35 {dimension_numbers = #tpu.dot_dimension_numbers<[1], [1], [0], [0], [0, 0, 1, 0], [], []>} : vector<16x32xbf16>, vector<128x32xbf16>, vector<16x128xf32> -> vector<16x128xf32>
    %101 = arith.addf %78, %100 : vector<16x128xf32>
    %c0_36 = arith.constant 0 : index
    %c0_37 = arith.constant 0 : index
    %102 = vector.load %arg5[%c0_36, %c0_37] : memref<1x128xf32, #tpu.memory_space<vmem>>, vector<1x128xf32>
    %103 = vector.broadcast %102 : vector<1x128xf32> to vector<16x128xf32>
    %104 = arith.addf %101, %103 : vector<16x128xf32>
    %105 = arith.addf %1, %104 : vector<16x128xf32>
    %c0_38 = arith.constant 0 : index
    %c0_39 = arith.constant 0 : index
    %106 = vector.load %arg6[%c0_38, %c0_39] : memref<1x128xf32, #tpu.memory_space<vmem>>, vector<1x128xf32>
    %c0_40 = arith.constant 0 : index
    %c0_41 = arith.constant 0 : index
    %107 = vector.load %arg7[%c0_40, %c0_41] : memref<1x128xf32, #tpu.memory_space<vmem>>, vector<1x128xf32>
    %cst_42 = arith.constant dense<0.000000e+00> : vector<16xf32>
    %108 = vector.multi_reduction <add>, %105, %cst_42 [1] : vector<16x128xf32> to vector<16xf32>
    %109 = vector.shape_cast %108 : vector<16xf32> to vector<16x1xf32>
    %cst_43 = arith.constant 1.280000e+02 : f32
    %110 = vector.broadcast %cst_43 : f32 to vector<16x1xf32>
    %111 = arith.divf %109, %110 : vector<16x1xf32>
    %112 = vector.broadcast %111 : vector<16x1xf32> to vector<16x128xf32>
    %113 = arith.subf %105, %112 : vector<16x128xf32>
    %114 = arith.mulf %113, %113 : vector<16x128xf32>
    %cst_44 = arith.constant dense<0.000000e+00> : vector<16xf32>
    %115 = vector.multi_reduction <add>, %114, %cst_44 [1] : vector<16x128xf32> to vector<16xf32>
    %116 = vector.shape_cast %115 : vector<16xf32> to vector<16x1xf32>
    %cst_45 = arith.constant 1.280000e+02 : f32
    %117 = vector.broadcast %cst_45 : f32 to vector<16x1xf32>
    %118 = arith.divf %116, %117 : vector<16x1xf32>
    %cst_46 = arith.constant 9.99999974E-6 : f32
    %119 = vector.broadcast %cst_46 : f32 to vector<16x1xf32>
    %120 = arith.addf %118, %119 : vector<16x1xf32>
    %121 = math.rsqrt %120 : vector<16x1xf32>
    %122 = vector.broadcast %121 : vector<16x1xf32> to vector<16x128xf32>
    %123 = arith.mulf %113, %122 : vector<16x128xf32>
    %124 = vector.broadcast %106 : vector<1x128xf32> to vector<16x128xf32>
    %125 = arith.mulf %123, %124 : vector<16x128xf32>
    %126 = vector.broadcast %107 : vector<1x128xf32> to vector<16x128xf32>
    %127 = arith.addf %125, %126 : vector<16x128xf32>
    %c0_47 = arith.constant 0 : index
    %c0_48 = arith.constant 0 : index
    %c0_49 = arith.constant 0 : index
    %128 = vector.load %arg8[%c0_47, %c0_48, %c0_49] : memref<1x16x128xf32, #tpu.memory_space<vmem>>, vector<1x16x128xf32>
    %129 = vector.shape_cast %128 : vector<1x16x128xf32> to vector<16x128xf32>
    %130 = vector.shape_cast %127 : vector<16x128xf32> to vector<1x16x128xf32>
    tpu.vector_store %arg8[%c0_47, %c0_48, %c0_49], %130 {strides = array<i32>} : memref<1x16x128xf32, #tpu.memory_space<vmem>>, vector<1x16x128xf32>,
    return
  }
  func.func @transform_0(%arg0: i32) -> (i32, i32, i32) {
    %c0_i32 = arith.constant 0 : i32
    %c0_i32_0 = arith.constant 0 : i32
    %c0_i32_1 = arith.constant 0 : i32
    return %arg0, %c0_i32, %c0_i32_0 : i32, i32, i32
  }
  func.func @transform_1(%arg0: i32) -> (i32, i32) {
    %c0_i32 = arith.constant 0 : i32
    %c0_i32_0 = arith.constant 0 : i32
    %c0_i32_1 = arith.constant 0 : i32
    return %c0_i32, %c0_i32_0 : i32, i32
  }
  func.func @transform_2(%arg0: i32) -> (i32, i32) {
    %c0_i32 = arith.constant 0 : i32
    %c0_i32_0 = arith.constant 0 : i32
    %c0_i32_1 = arith.constant 0 : i32
    return %c0_i32, %c0_i32_0 : i32, i32
  }
  func.func @transform_3(%arg0: i32) -> (i32, i32, i32) {
    %c0_i32 = arith.constant 0 : i32
    %c0_i32_0 = arith.constant 0 : i32
    %c0_i32_1 = arith.constant 0 : i32
    %c0_i32_2 = arith.constant 0 : i32
    return %c0_i32, %c0_i32_0, %c0_i32_1 : i32, i32, i32
  }
  func.func @transform_4(%arg0: i32) -> (i32, i32) {
    %c0_i32 = arith.constant 0 : i32
    %c0_i32_0 = arith.constant 0 : i32
    %c0_i32_1 = arith.constant 0 : i32
    return %c0_i32, %c0_i32_0 : i32, i32
  }
  func.func @transform_5(%arg0: i32) -> (i32, i32) {
    %c0_i32 = arith.constant 0 : i32
    %c0_i32_0 = arith.constant 0 : i32
    %c0_i32_1 = arith.constant 0 : i32
    return %c0_i32, %c0_i32_0 : i32, i32
  }
  func.func @transform_6(%arg0: i32) -> (i32, i32) {
    %c0_i32 = arith.constant 0 : i32
    %c0_i32_0 = arith.constant 0 : i32
    %c0_i32_1 = arith.constant 0 : i32
    return %c0_i32, %c0_i32_0 : i32, i32
  }
  func.func @transform_7(%arg0: i32) -> (i32, i32, i32) {
    %c0_i32 = arith.constant 0 : i32
    %c0_i32_0 = arith.constant 0 : i32
    %c0_i32_1 = arith.constant 0 : i32
    return %arg0, %c0_i32, %c0_i32_0 : i32, i32, i32
  }
}

</mosaic_0001>

<bundles_post_ra>
// kernel: tpu_custom_call.1
= control target key start
LH: loop header
LB: loop body
LE: loop exit
PB: predicated region body
PF: predicated region fallthrough
CT: control target
= control target key end

     0   :  { %12 = vsyncpa [#allocation3], 0  ;;  %s3655_s0 = inlined_call_operand.vmem [shape: f32[2,16,128], index: 0, kind: input, shape index: {}]   ;;  %s3656_s1 = inlined_call_operand.vmem [shape: bf16[384,128], index: 1, kind: input, shape index: {}]   ;;  %s3657_s2 = inlined_call_operand.vmem [shape: f32[384,1], index: 2, kind: input, shape index: {}]   ;;  %s3658_s3 = inlined_call_operand.vmem [shape: bf16[4,128,32], index: 3, kind: input, shape index: {}]   ;;  %s3659_s4 = inlined_call_operand.vmem [shape: f32[1,128], index: 4, kind: input, shape index: {}]   ;;  %s3660_s5 = inlined_call_operand.vmem [shape: f32[1,128], index: 5, kind: input, shape index: {}]   ;;  %s3661_s6 = inlined_call_operand.vmem [shape: f32[1,128], index: 6, kind: input, shape index: {}]   ;;  %s3662_s7 = inlined_call_operand.hbm [shape: f32[2,16,128], index: 7, kind: output, shape index: {}]  }
   0x1   :  { %14 = vsyncpa [#allocation3 + $0x1], 0  ;;  %s2945_s24 = smov 0   ;;  %s2947_s25 = smov 0  }
   0x2   :  { %s2949_s26 = smov 0   ;;  %s2951_s27 = smov 0  }
   0x3 LB: > { %s2966_s28 = sadd.s32 4294967295, %s2897_s27   ;;  %s2281_s29 = sadd.s32 4294967294, %s2897_s27   ;;  %s2897_s27 = sphi %s2951_s27, %s3668_s27   ;;  %s2893_s26 = sphi %s2949_s26, %s3667_s26   ;;  %s2889_s25 = sphi %s2947_s25, %s3666_s25   ;;  %s2885_s24 = sphi %s2945_s24, %s3665_s24  }
   0x4   : > { %s2970_s30 = sadd.s32 1, %s2897_s27   ;;  %s179_s8 = sadd.s32 1, %s2893_s26 }
   0x5   : > { %s176_s9 = ssub.s32 %s2897_s27, %s2970_s30  ;;  %p189_p0 = scmp.ne.s32.totalorder %s2893_s26, %s2889_s25 }
   0x6   : > { %p177_p1 = scmp.eq.s32.totalorder %s176_s9, 0  ;;  %p190_p2 = scmp.eq.s32.totalorder %s2966_s28, 1 }
   0x7   : > { %p195_p3 = scmp.ne.s32.totalorder %s2889_s25, %s2885_s24  ;;  %p196_p4 = scmp.eq.s32.totalorder %s2281_s29, 1 }
   0x8   : > { %s2981_s10 = scalar_select %p177_p1, %s2893_s26, %s179_s8  }
   0x9   : > { %p2983_p5 = por %p190_p2, %p189_p0  ;;  %p2987_p6 = por %p196_p4, %p195_p3 }
   0xa   : > { %p2284_p7 = scmp.ge.s32.totalorder %s2897_s27, 1  ;;  %p240_p8 = scmp.lt.s32.totalorder %s2897_s27, 3 }
   0xc   : > { %p241_p9 = pnand %p2284_p7, %p240_p8 }
   0xd   : > { %p272_p10 = scmp.lt.s32.totalorder (!%p241_p9), %s2966_s28, 1  ;;  %v2741_v0 = vld [vmem:[%s3656_s1] sm:$0xff] (!%p241_p9)   ;;  %v2899_v1 = vmov (!%p241_p9), 0   ;;  %v331_v6 = vld [vmem:[%s3657_s2 + $0x10] sm:$0xff] (!%p241_p9)  ;;  %v2742_v7 = vld [vmem:[%s3656_s1 + $0x8] sm:$0xff] (!%p241_p9)   ;;  %v2900_v24 = vmov (!%p241_p9), 0.0  }
   0xe   : > { %244 = sbr.rel (%p241_p9) target bundleno = 3726 (0xe8e), region = 48  ;;  %2505 = vmatprep.mubr.bf16.mxu0 (!%p241_p9), %v2741_v0  ;;  %2739 = vset.pattern.permute.xlu0 (!%p241_p9), %v2899_v1  ;;  %v329_v5 = vld [vmem:[%s3657_s2] sm:$0xff] (!%p241_p9)  ;;  %v2743_v8 = vld [vmem:[%s3656_s1 + $0x10] sm:$0xff] (!%p241_p9)   ;;  %v330_v9 = vld [vmem:[%s3657_s2 + $0x8] sm:$0xff] (!%p241_p9)  ;;  %vm2901_vm0 = vmmov (!%p241_p9), 0   ;;  %vm1026_vm1 = vcmask (!%p241_p9), 261120  }
   0xf   : > { %2740 = vset.pattern.permute.xlu1 (!%p241_p9), %v2899_v1  ;;  %379 = vperm.xlu0 (!%p241_p9), %2739, %v329_v5   ;;  %v332_v10 = vld [vmem:[%s3657_s2 + $0x18] sm:$0xff] (!%p241_p9)  ;;  %v345_v11 = vld [vmem:[%s3657_s2 + $0x80] sm:$0xff] (!%p241_p9)  ;;  %v346_v12 = vld [vmem:[%s3657_s2 + $0x88] sm:$0xff] (!%p241_p9)  ;;  %vm1071_vm2 = vcmask (!%p241_p9), 130048   ;;  %s2417_s8 = sshll.u32 (!%p241_p9), %s2966_s28, 8 }
  0x10   : > { %389 = vperm.xlu1 (!%p241_p9), %2740, %v331_v6   ;;  %v347_v13 = vld [vmem:[%s3657_s2 + $0x90] sm:$0xff] (!%p241_p9)  ;;  %v2744_v14 = vld [vmem:[%s3656_s1 + $0x18] sm:$0xff] (!%p241_p9)   ;;  %v2745_v16 = vld [vmem:[%s3656_s1 + $0x20] sm:$0xff] (!%p241_p9)  }
  0x11   : > { %v348_v15 = vld [vmem:[%s3657_s2 + $0x98] sm:$0xff] (!%p241_p9)  ;;  %v2746_v17 = vld [vmem:[%s3656_s1 + $0x28] sm:$0xff] (!%p241_p9)   ;;  %v2747_v18 = vld [vmem:[%s3656_s1 + $0x30] sm:$0xff] (!%p241_p9)  }
  0x12   : > { %v2748_v19 = vld [vmem:[%s3656_s1 + $0x38] sm:$0xff] (!%p241_p9)   ;;  %v2749_v20 = vld [vmem:[%s3656_s1 + $0x40] sm:$0xff] (!%p241_p9)   ;;  %v2750_v21 = vld [vmem:[%s3656_s1 + $0x48] sm:$0xff] (!%p241_p9)  }
  0x13   : > { %384 = vperm.xlu0 (!%p241_p9), %2739, %v330_v9   ;;  %v2751_v22 = vld [vmem:[%s3656_s1 + $0xb0] sm:$0xff] (!%p241_p9)   ;;  %v2752_v23 = vld [vmem:[%s3656_s1 + $0xb8] sm:$0xff] (!%p241_p9)   ;;  %v2755_v27 = vld [vmem:[%s3656_s1 + $0x60] sm:$0xff] (!%p241_p9)  }
  0x14   : > { %394 = vperm.xlu1 (!%p241_p9), %2740, %v332_v10   ;;  %2549 = vmatprep.mubr.bf16.mxu1 (!%p241_p9), %v2751_v22  ;;  %v2753_v25 = vld [vmem:[%s3656_s1 + $0x50] sm:$0xff] (!%p241_p9)   ;;  %v2754_v26 = vld [vmem:[%s3656_s1 + $0x58] sm:$0xff] (!%p241_p9)   ;;  %v2756_v28 = vld [vmem:[%s3656_s1 + $0x68] sm:$0xff] (!%p241_p9)  }
  0x15   : > { %s273_s15 = scalar_select %p272_p10, %s2966_s28, 1  ;;  %v2757_v29 = vld [vmem:[%s3656_s1 + $0x70] sm:$0xff]   ;;  %v2758_v32 = vld [vmem:[%s3656_s1 + $0x78] sm:$0xff]   ;;  %v2759_v33 = vld [vmem:[%s3656_s1 + $0x80] sm:$0xff]  }
  0x16   : > { %v2760_v46 = vld [vmem:[%s3656_s1 + $0x88] sm:$0xff]   ;;  %v333_v22 = vld [vmem:[%s3657_s2 + $0x20] sm:$0xff]  ;;  %s2902_s28 = smov [#allocation2]  }
  0x17   : > { %s2416_s16 = sshll.u32 %s273_s15, 4  ;;  %459 = vperm.xlu0 %2739, %v345_v11   ;;  %s2839_s20 = sshll.u32 %s2902_s28, 4  ;;  %s2840_s20 = int_to_ptr.vmem [resolvable:$false] %s2839_s20 }
  0x18   : > { %s3001_s19 = scalar_lea.vmem %s3655_s0, %s2416_s16  ;;  %464 = vperm.xlu1 %2740, %v346_v12   ;;  %s3610_s16 = scalar_lea.hbm %s3662_s7, %s2417_s8 }
  0x19   : > { %v278_v2 = vld [vmem:[%s3001_s19] sm:$0xff]  ;;  %v279_v3 = vld [vmem:[%s3001_s19 + $0x8] sm:$0xff]  ;;  %s2841_s21 = scalar_lea.vmem %s2840_s20, 512 }
  0x1a   : > { %v280_v4 = vpack.c.bf16 %v279_v3, %v278_v2 }
  0x1b   : > { %469 = vperm.xlu0 %2739, %v347_v13  }
  0x1c   : > { %2503 = vmatprep.subr.bf16.mxu0 %v280_v4  ;;  %2689 = vmatprep.subr.bf16.mxu1 %v280_v4 }
  0x1d   : > { %2504 = vmatpush3.bf16.xpose.msra.mxu0 %v280_v4  ;;  %2690 = vmatpush3.bf16.xpose.msra.mxu1 %v280_v4 }
  0x1e   : > { %474 = vperm.xlu1 %2740, %v348_v15   ;;  %2553 = vmatprep.subr.bf16.mxu1 %v2900_v24 }
  0x1f   : > { %2601 = vmatprep.subr.bf16.mxu0 %v2900_v24 }
  0x24   : > { %2506 = vmatmul.mubr.bf16.vlgmr.msra.gmra.mrb[0].mxu0 %v2742_v7  ;;  %2550 = vmatmul.mubr.bf16.vlgmr.msra.gmra.mrb[0].mxu1 %v2752_v23 }
  0x25   : > { %2509 = vmatprep.mubr.bf16.mxu0 %v2743_v8  ;;  %2557 = vmatprep.mubr.msk.bf16.mxu1 %vm2901_vm0, %v2900_v24 }
  0x2c   : > { %2510 = vmatmul.mubr.bf16.gmra.mrb[4].mxu0 %v2744_v14 }
  0x2d   : > { %2513 = vmatprep.mubr.bf16.mxu0 %v2745_v16 }
  0x34   : > { %2514 = vmatmul.mubr.bf16.gmra.mrb[8].mxu0 %v2746_v17 }
  0x35   : > { %2517 = vmatprep.mubr.bf16.mxu0 %v2747_v18 }
  0x3c   : > { %2518 = vmatmul.mubr.bf16.gmra.mrb[12].mxu0 %v2748_v19 }
  0x3d   : > { %2521 = vmatprep.mubr.bf16.mxu0 %v2749_v20 }
  0x44   : > { %2522 = vmatmul.mubr.bf16.gmra.mrb[16].mxu0 %v2750_v21 }
  0x45   : > { %2525 = vmatprep.mubr.bf16.mxu0 %v2753_v25 }
  0x4c   : > { %2526 = vmatmul.mubr.bf16.gmra.mrb[20].mxu0 %v2754_v26 }
  0x4d   : > { %2529 = vmatprep.mubr.bf16.mxu0 %v2755_v27 }
  0x54   : > { %2530 = vmatmul.mubr.bf16.gmra.mrb[24].mxu0 %v2756_v28  ;;  %v335_v28 = vld [vmem:[%s3657_s2 + $0x30] sm:$0xff] }
  0x55   : > { %2533 = vmatprep.mubr.bf16.mxu0 %v2757_v29 }
  0x5c   : > { %2534 = vmatmul.mubr.bf16.gmra.mrb[28].mxu0 %v2758_v32  ;;  %v334_v32 = vld [vmem:[%s3657_s2 + $0x28] sm:$0xff] }
  0x5d   : > { %2537 = vmatprep.mubr.bf16.mxu0 %v2759_v33 }
  0x64   : > { %2538 = vmatmul.mubr.bf16.gmra.mrb[32].mxu0 %v2760_v46  ;;  %v350_v46 = vld [vmem:[%s3657_s2 + $0xa8] sm:$0xff] }
  0x8e   : > { %v380_v31 = vpop.permute.xlu0 %379 }
  0x8f   : > { %v390_v30 = vpop.permute.xlu1 %389 }
  0x92   : > { %v385_v38 = vpop.permute.xlu0 %384 }
  0x93   : > { %v395_v36 = vpop.permute.xlu1 %394 }
  0x96   : > { %v460_v58 = vpop.permute.xlu0 %459 }
  0x97   : > { %v465_v60 = vpop.permute.xlu1 %464 }
  0x9a   : > { %v470_v62 = vpop.permute.xlu0 %469 }
  0x9d   : > { %v475_v0 = vpop.permute.xlu1 %474 }
  0xf7   : > { %v2507_v34 = vpop.f32.mrb[0].mxu0  ;;  %v3116_v10 = vpop.f32.mrb[0].mxu1 }
  0xf8   : > { %v795_v35 = vpop.f32.mrb[1].mxu0  ;;  %v804_v39 = vadd.f32 %v2507_v34, %v390_v30  ;;  %v3118_v11 = vpop.f32.mrb[1].mxu1  ;;  %v336_v34 = vld [vmem:[%s3657_s2 + $0x38] sm:$0xff] }
  0xf9   : > { %v2508_v37 = vpop.f32.mrb[2].mxu0  ;;  %v796_v42 = vadd.f32 %v795_v35, %v380_v31  ;;  %v3120_v12 = vpop.f32.mrb[2].mxu1 }
  0xfa   : > { %v807_v40 = vadd.f32 %v2508_v37, %v395_v36  ;;  %v798_v41 = vpop.f32.mrb[3].mxu0  ;;  %v3122_v13 = vpop.f32.mrb[3].mxu1 }
  0xfb   : > { %v799_v43 = vadd.f32 %v798_v41, %v385_v38  ;;  %v362_v38 = vld [vmem:[%s3657_s2 + $0x108] sm:$0xff] }
  0xfc   : > { %v987_v44 = vpack.c.bf16 %v807_v40, %v804_v39  ;;  %v361_v40 = vld [vmem:[%s3657_s2 + $0x100] sm:$0xff] }
  0xfd   : > { %v986_v45 = vpack.c.bf16 %v799_v43, %v796_v42  ;;  %v349_v43 = vld [vmem:[%s3657_s2 + $0xa0] sm:$0xff] }
  0xff   : > { %1010 = vxpose.xlu0.c.b16.start [1/2] (short) (narrow) %v986_v45, 16  ;;  %v3090_v47 = vpop.f32.mrb[4].mxu0  ;;  %v364_v45 = vld [vmem:[%s3657_s2 + $0x118] sm:$0xff] }
 0x100   : > { %v3092_v48 = vpop.f32.mrb[5].mxu0 }
 0x101   : > { %v3094_v49 = vpop.f32.mrb[6].mxu0 }
 0x102   : > { %v3096_v50 = vpop.f32.mrb[7].mxu0 }
 0x103   : > { %1011 = vxpose.xlu0.c.b16.end [2/2] (short) (narrow) %v987_v44, 16  ;;  %v363_v44 = vld [vmem:[%s3657_s2 + $0x110] sm:$0xff] }
 0x107   : > { %v3098_v51 = vpop.f32.mrb[8].mxu0 }
 0x108   : > { %v3100_v52 = vpop.f32.mrb[9].mxu0 }
 0x109   : > { %v3102_v53 = vpop.f32.mrb[10].mxu0 }
 0x10a   : > { %v3104_v54 = vpop.f32.mrb[11].mxu0 }
 0x10f   : > { %v3106_v55 = vpop.f32.mrb[12].mxu0 }
 0x110   : > { %v3108_v56 = vpop.f32.mrb[13].mxu0 }
 0x111   : > { %v3110_v57 = vpop.f32.mrb[14].mxu0 }
 0x112   : > { %v3112_v59 = vpop.f32.mrb[15].mxu0 }
 0x117   : > { %v2523_v61 = vpop.f32.mrb[16].mxu0 }
 0x118   : > { %v859_v63 = vpop.f32.mrb[17].mxu0  ;;  %v868_v2 = vadd.f32 %v2523_v61, %v470_v62 }
 0x119   : > { %v2524_v1 = vpop.f32.mrb[18].mxu0  ;;  %v860_v5 = vadd.f32 %v859_v63, %v460_v58 }
 0x11a   : > { %v871_v3 = vadd.f32 %v2524_v1, %v475_v0  ;;  %v862_v4 = vpop.f32.mrb[19].mxu0 }
 0x11b   : > { %v863_v6 = vadd.f32 %v862_v4, %v465_v60 }
 0x11c   : > { %v995_v7 = vpack.c.bf16 %v871_v3, %v868_v2 }
 0x11d   : > { %v994_v8 = vpack.c.bf16 %v863_v6, %v860_v5 }
 0x11f   : > { %2554 = vmatpush3.bf16.msra.mxu1 %v994_v8  ;;  %v3124_v14 = vpop.f32.mrb[20].mxu0 }
 0x120   : > { %2555 = vmatprep.subr.bf16.mxu1 %v2900_v24  ;;  %v3126_v15 = vpop.f32.mrb[21].mxu0 }
 0x121   : > { %v3133_v23 = vpop.f32.mrb[22].mxu0 }
 0x122   : > { %v3135_v25 = vpop.f32.mrb[23].mxu0 }
 0x123   : > { %2556 = vmatpush3.bf16.msra.mxu1 %v995_v7 }
 0x127   : > { %v3137_v26 = vpop.f32.mrb[24].mxu0 }
 0x128   : > { %v3139_v27 = vpop.f32.mrb[25].mxu0 }
 0x129   : > { %v3144_v29 = vpop.f32.mrb[26].mxu0 }
 0x12a   : > { %v3146_v30 = vpop.f32.mrb[27].mxu0 }
 0x12f   : > { %v3148_v31 = vpop.f32.mrb[28].mxu0 }
 0x130   : > { %v3153_v33 = vpop.f32.mrb[29].mxu0 }
 0x131   : > { %v3158_v35 = vpop.f32.mrb[30].mxu0 }
 0x132   : > { %v3160_v36 = vpop.f32.mrb[31].mxu0 }
 0x137   : > { %v2539_v37 = vpop.f32.mrb[32].mxu0 }
 0x138   : > { %v923_v39 = vpop.f32.mrb[33].mxu0 }
 0x139   : > { %v2540_v41 = vpop.f32.mrb[34].mxu0 }
 0x13a   : > { %v926_v42 = vpop.f32.mrb[35].mxu0 }
 0x165   : > { %v1018_v9 = vpop.trf.xlu0 }
 0x166   : > { %2558 = vmatmul.mubr.msk.bf16.vlgmr.msra.gmra.mrb[4].mxu1 %vm1026_vm1, %v1018_v9 }
 0x239   : > { %v1064_v16 = vpop.f32.mrb[4].mxu1 }
 0x23a   : > { %v2559_v17 = vpop.f32.mrb[5].mxu1  ;;  %v1072_v18 = vsel %vm1071_vm2, %v1064_v16, -inf }
 0x23b   : > { %1073 = vmax.xlane.f32.xlu1 %v1072_v18  ;;  %v1067_v19 = vpop.f32.mrb[6].mxu1 }
 0x23c   : > { %v2560_v20 = vpop.f32.mrb[7].mxu1  ;;  %v1075_v21 = vsel %vm1071_vm2, %v1067_v19, -inf }
 0x23d   : > { %1076 = vmax.xlane.f32.xlu0 %v1075_v21 }
 0x24c   : > { %399 = vperm.xlu1 %2740, %v333_v22  }
 0x250   : > { %409 = vperm.xlu1 %2740, %v335_v28  }
 0x253   : > { %404 = vperm.xlu0 %2739, %v334_v32  }
 0x254   : > { %414 = vperm.xlu1 %2740, %v336_v34  }
 0x257   : > { %544 = vperm.xlu0 %2739, %v362_v38  }
 0x258   : > { %539 = vperm.xlu1 %2740, %v361_v40  }
 0x25b   : > { %479 = vperm.xlu0 %2739, %v349_v43  }
 0x25c   : > { %549 = vperm.xlu1 %2740, %v363_v44  }
 0x260   : > { %554 = vperm.xlu1 %2740, %v364_v45  }
 0x264   : > { %484 = vperm.xlu1 %2740, %v350_v46   ;;  %v351_v46 = vld [vmem:[%s3657_s2 + $0xb0] sm:$0xff] }
 0x2c8   : > { %v1074_v58 = vpop.xlane.xlu1 %1073 }
 0x2c9   : > { %v1078_v60 = vsub.f32 %v1064_v16, %v1074_v58 }
 0x2ca   : > { %v1077_v61 = vpop.xlane.xlu0 %1076 }
 0x2cb   : > { %v1080_v62 = vmul.f32 1.442695, %v1078_v60  ;;  %v1079_v63 = vsub.f32 %v1067_v19, %v1077_v61 }
 0x2cc   : > { %v400_v0 = vpop.permute.xlu1 %399 }
 0x2cd   : > { %2797 = vpow2.f32 %v1080_v62  ;;  %v1082_v1 = vmul.f32 1.442695, %v1079_v63  ;;  %v812_v4 = vadd.f32 %v3092_v48, %v400_v0 }
 0x2cf   : > { %2799 = vpow2.f32 %v1082_v1 }
 0x2d0   : > { %v410_v2 = vpop.permute.xlu1 %409 }
 0x2d1   : > { %v820_v7 = vadd.f32 %v3090_v47, %v410_v2 }
 0x2d2   : > { %v405_v3 = vpop.permute.xlu0 %404 }
 0x2d3   : > { %v815_v5 = vadd.f32 %v3096_v50, %v405_v3 }
 0x2d4   : > { %v415_v6 = vpop.permute.xlu1 %414 }
 0x2d5   : > { %v988_v8 = vpack.c.bf16 %v815_v5, %v812_v4  ;;  %v823_v9 = vadd.f32 %v3094_v49, %v415_v6 }
 0x2d6   : > { %v545_v16 = vpop.permute.xlu0 %544 }
 0x2d7   : > { %v2798_v17 = vpop.eup %2797  ;;  %v989_v18 = vpack.c.bf16 %v823_v9, %v820_v7  ;;  %v927_v22 = vadd.f32 %v926_v42, %v545_v16 }
 0x2d8   : > { %v540_v19 = vpop.permute.xlu1 %539  ;;  %v1084_v20 = vsel %vm1071_vm2, %v2798_v17, 0.0 }
 0x2d9   : > { %v2800_v21 = vpop.eup %2799  ;;  %v924_v28 = vadd.f32 %v923_v39, %v540_v19  ;;  %1085 = vadd.xlane.f32.xlu1 %v1084_v20  ;;  %v352_v39 = vld [vmem:[%s3657_s2 + $0xb8] sm:$0xff] }
 0x2da   : > { %v1087_v48 = vsel %vm1071_vm2, %v2800_v21, 0.0  ;;  %v480_v38 = vpop.permute.xlu0 %479 }
 0x2db   : > { %v1002_v32 = vpack.c.bf16 %v927_v22, %v924_v28  ;;  %1088 = vadd.xlane.f32.xlu0 %v1087_v48  ;;  %v876_v44 = vadd.f32 %v3126_v15, %v480_v38  ;;  %v2762_v15 = vld [vmem:[%s3656_s1 + $0x98] sm:$0xff]   ;;  %v365_v28 = vld [vmem:[%s3657_s2 + $0x120] sm:$0xff] }
 0x2dc   : > { %v550_v50 = vpop.permute.xlu1 %549  ;;  %v337_v38 = vld [vmem:[%s3657_s2 + $0x40] sm:$0xff] }
 0x2dd   : > { %2563 = vmatprep.mubr.msk.bf16.mxu1 %vm1071_vm2, %v1002_v32  ;;  %v932_v34 = vadd.f32 %v2539_v37, %v550_v50  ;;  %v2761_v37 = vld [vmem:[%s3656_s1 + $0x90] sm:$0xff]  }
 0x2de   : > { %2541 = vmatprep.mubr.bf16.mxu0 %v2761_v37  ;;  %v367_v50 = vld [vmem:[%s3657_s2 + $0x130] sm:$0xff] }
 0x2df   : > { %2542 = vmatmul.mubr.bf16.gmra.mrb[36].mxu0 %v2762_v15 }
 0x2e0   : > { %v555_v47 = vpop.permute.xlu1 %554 }
 0x2e1   : > { %v935_v49 = vadd.f32 %v2540_v41, %v555_v47  ;;  %v366_v47 = vld [vmem:[%s3657_s2 + $0x128] sm:$0xff] }
 0x2e3   : > { %v1003_v40 = vpack.c.bf16 %v935_v49, %v932_v34 }
 0x2e4   : > { %v485_v43 = vpop.permute.xlu1 %484 }
 0x2e5   : > { %v879_v45 = vadd.f32 %v3135_v25, %v485_v43  ;;  %v353_v43 = vld [vmem:[%s3657_s2 + $0xc0] sm:$0xff] }
 0x2e7   : > { %v996_v42 = vpack.c.bf16 %v879_v45, %v876_v44  ;;  %v355_v44 = vld [vmem:[%s3657_s2 + $0xd0] sm:$0xff] }
 0x2ea   : > { %494 = vperm.xlu1 %2740, %v352_v39  }
 0x2f1   : > { %489 = vperm.xlu0 %2739, %v351_v46  }
 0x30f   : > { %1187 = vxpose.xlu0.c.b16.start [1/2] (short) (narrow) %v988_v8, 16 }
 0x313   : > { %1188 = vxpose.xlu0.c.b16.end [2/2] (short) (narrow) %v989_v18, 16 }
 0x366   : > { %v1086_v25 = vpop.xlane.xlu1 %1085 }
 0x367   : > { %2801 = vrcp.f32 %v1086_v25 }
 0x368   : > { %v1089_v41 = vpop.xlane.xlu0 %1088 }
 0x369   : > { %2803 = vrcp.f32 %v1089_v41 }
 0x36a   : > { %v495_v58 = vpop.permute.xlu1 %494 }
 0x36b   : > { %v887_v62 = vadd.f32 %v3133_v23, %v495_v58 }
 0x370   : > { %v490_v60 = vpop.permute.xlu0 %489 }
 0x371   : > { %v2802_v61 = vpop.eup %2801  ;;  %v884_v63 = vadd.f32 %v3124_v14, %v490_v60 }
 0x372   : > { %v1092_v2 = vmul.f32 %v2802_v61, %v2798_v17 }
 0x373   : > { %v2804_v0 = vpop.eup %2803  ;;  %v997_v1 = vpack.c.bf16 %v887_v62, %v884_v63 }
 0x374   : > { %v1093_v3 = vmul.f32 %v2804_v0, %v2800_v21 }
 0x375   : > { %v1195_v14 = vpop.trf.xlu0 }
 0x376   : > { %v1094_v4 = vpack.c.bf16 %v1093_v3, %v1092_v2  ;;  %v368_v2 = vld [vmem:[%s3657_s2 + $0x138] sm:$0xff]  ;;  %v338_v3 = vld [vmem:[%s3657_s2 + $0x48] sm:$0xff] }
 0x378   : > { %2691 = vmatprep.subr.msk.bf16.mxu1 %vm1071_vm2, %v1094_v4  ;;  %v1102_v5 = vsel %vm1071_vm2, %v1094_v4, 0  ;;  %v340_v4 = vld [vmem:[%s3657_s2 + $0x58] sm:$0xff] }
 0x379   : > { %2562 = vmatpush3.bf16.xpose.msra.mxu1 %v1102_v5  ;;  %v354_v5 = vld [vmem:[%s3657_s2 + $0xc8] sm:$0xff] }
 0x37a   : > { %2567 = vmatprep.subr.bf16.mxu1 %v2900_v24 }
 0x380   : > { %2564 = vmatmul.mubr.msk.bf16.vlgmr.msra.gmra.mrb[8].mxu1 %vm1071_vm2, %v1003_v40  ;;  %v339_v40 = vld [vmem:[%s3657_s2 + $0x50] sm:$0xff] }
 0x381   : > { %2568 = vmatpush3.bf16.msra.mxu1 %v996_v42  ;;  %2571 = vmatprep.mubr.msk.bf16.mxu1 %vm2901_vm0, %v2900_v24 }
 0x382   : > { %2569 = vmatprep.subr.bf16.mxu1 %v2900_v24 }
 0x385   : > { %2570 = vmatpush3.bf16.msra.mxu1 %v997_v1 }
 0x388   : > { %2572 = vmatmul.mubr.msk.bf16.vlgmr.msra.gmra.mrb[12].mxu1 %vm1026_vm1, %v1195_v14  ;;  %v356_v14 = vld [vmem:[%s3657_s2 + $0xd8] sm:$0xff] }
 0x3b2   : > { %v2543_v48 = vpop.f32.mrb[36].mxu0 }
 0x3b3   : > { %v939_v32 = vpop.f32.mrb[37].mxu0 }
 0x3b4   : > { %v2544_v34 = vpop.f32.mrb[38].mxu0 }
 0x3b5   : > { %v942_v49 = vpop.f32.mrb[39].mxu0 }
 0x453   : > { %v3211_v23 = vpop.f32.mrb[8].mxu1 }
 0x454   : > { %v3213_v6 = vpop.f32.mrb[9].mxu1 }
 0x455   : > { %v3215_v7 = vpop.f32.mrb[10].mxu1 }
 0x456   : > { %v1154_v8 = vpack.c.bf16 %v3215_v7, %v3211_v23  ;;  %v3219_v9 = vpop.f32.mrb[11].mxu1 }
 0x457   : > { %v1153_v16 = vpack.c.bf16 %v3219_v9, %v3213_v6 }
 0x45b   : > { %v1240_v17 = vpop.f32.mrb[12].mxu1 }
 0x45c   : > { %v2573_v18 = vpop.f32.mrb[13].mxu1  ;;  %v1247_v19 = vsel %vm1071_vm2, %v1240_v17, -inf }
 0x45d   : > { %1248 = vmax.xlane.f32.xlu1 %v1247_v19  ;;  %v1243_v20 = vpop.f32.mrb[14].mxu1 }
 0x45e   : > { %v2574_v21 = vpop.f32.mrb[15].mxu1  ;;  %v1250_v22 = vsel %vm1071_vm2, %v1243_v20, -inf }
 0x45f   : > { %1251 = vmax.xlane.f32.xlu0 %v1250_v22 }
 0x46e   : > { %559 = vperm.xlu1 %2740, %v365_v28  }
 0x472   : > { %569 = vperm.xlu1 %2740, %v367_v50  }
 0x475   : > { %564 = vperm.xlu0 %2739, %v366_v47  }
 0x479   : > { %419 = vperm.xlu0 %2739, %v337_v38  }
 0x47d   : > { %429 = vperm.xlu0 %2739, %v339_v40  }
 0x481   : > { %499 = vperm.xlu0 %2739, %v353_v43  }
 0x485   : > { %509 = vperm.xlu0 %2739, %v355_v44  }
 0x4ea   : > { %v1249_v45 = vpop.xlane.xlu1 %1248 }
 0x4eb   : > { %v1253_v42 = vsub.f32 %v1240_v17, %v1249_v45 }
 0x4ec   : > { %v1252_v39 = vpop.xlane.xlu0 %1251 }
 0x4ed   : > { %v1255_v46 = vmul.f32 1.442695, %v1253_v42  ;;  %v1254_v37 = vsub.f32 %v1243_v20, %v1252_v39 }
 0x4ee   : > { %v560_v25 = vpop.permute.xlu1 %559 }
 0x4ef   : > { %2805 = vpow2.f32 %v1255_v46  ;;  %v1257_v15 = vmul.f32 1.442695, %v1254_v37  ;;  %v940_v58 = vadd.f32 %v939_v32, %v560_v25 }
 0x4f1   : > { %2807 = vpow2.f32 %v1257_v15 }
 0x4f2   : > { %v570_v17 = vpop.permute.xlu1 %569 }
 0x4f3   : > { %v948_v22 = vadd.f32 %v2543_v48, %v570_v17  ;;  %v2769_v17 = vld [vmem:[%s3658_s3 + $0x70] sm:$0xff]  }
 0x4f4   : > { %v565_v41 = vpop.permute.xlu0 %564 }
 0x4f5   : > { %v943_v60 = vadd.f32 %v942_v49, %v565_v41 }
 0x4f7   : > { %v1004_v61 = vpack.c.bf16 %v943_v60, %v940_v58 }
 0x4f8   : > { %v420_v19 = vpop.permute.xlu0 %419 }
 0x4f9   : > { %v2806_v62 = vpop.eup %2805  ;;  %2577 = vmatprep.mubr.msk.bf16.mxu1 %vm1071_vm2, %v1004_v61  ;;  %v828_v38 = vadd.f32 %v3100_v52, %v420_v19  ;;  %v2770_v19 = vld [vmem:[%s3658_s3 + $0x78] sm:$0xff]  }
 0x4fa   : > { %v1259_v63 = vsel %vm1071_vm2, %v2806_v62, 0.0 }
 0x4fb   : > { %v2808_v0 = vpop.eup %2807  ;;  %1260 = vadd.xlane.f32.xlu1 %v1259_v63  ;;  %v2765_v63 = vld [vmem:[%s3658_s3 + $0x50] sm:$0xff]  }
 0x4fc   : > { %v1262_v1 = vsel %vm1071_vm2, %v2808_v0, 0.0  ;;  %v430_v32 = vpop.permute.xlu0 %429 }
 0x4fd   : > { %v836_v37 = vadd.f32 %v3098_v51, %v430_v32 }
 0x4ff   : > { %1263 = vadd.xlane.f32.xlu1 %v1262_v1  ;;  %v2766_v1 = vld [vmem:[%s3658_s3 + $0x58] sm:$0xff]  }
 0x500   : > { %v500_v45 = vpop.permute.xlu0 %499 }
 0x504   : > { %v510_v58 = vpop.permute.xlu0 %509 }
 0x510   : > { %574 = vperm.xlu1 %2740, %v368_v2   ;;  %v1416_v2 = vsel %vm1026_vm1, %v2766_v1, 0  ;;  %v2773_v1 = vld [vmem:[%s3658_s3] sm:$0xff]  }
 0x514   : > { %424 = vperm.xlu1 %2740, %v338_v3   ;;  %v2767_v3 = vld [vmem:[%s3658_s3 + $0x60] sm:$0xff]  }
 0x518   : > { %434 = vperm.xlu1 %2740, %v340_v4   ;;  %v1419_v4 = vsel %vm1026_vm1, %v2767_v3, 0  ;;  %v2774_v3 = vld [vmem:[%s3658_s3 + $0x8] sm:$0xff]  }
 0x51c   : > { %504 = vperm.xlu1 %2740, %v354_v5   ;;  %v2768_v5 = vld [vmem:[%s3658_s3 + $0x68] sm:$0xff]  }
 0x520   : > { %514 = vperm.xlu1 %2740, %v356_v14   ;;  %v1422_v14 = vsel %vm1026_vm1, %v2768_v5, 0  ;;  %v2775_v5 = vld [vmem:[%s3658_s3 + $0x10] sm:$0xff]  }
 0x588   : > { %v1261_v18 = vpop.xlane.xlu1 %1260 }
 0x589   : > { %2809 = vrcp.f32 %v1261_v18  ;;  %v1425_v18 = vsel %vm1026_vm1, %v2769_v17, 0  ;;  %v2776_v17 = vld [vmem:[%s3658_s3 + $0x18] sm:$0xff]  }
 0x58c   : > { %v1264_v20 = vpop.xlane.xlu1 %1263 }
 0x58d   : > { %2811 = vrcp.f32 %v1264_v20  ;;  %v1428_v20 = vsel %vm1026_vm1, %v2770_v19, 0  ;;  %v2777_v19 = vld [vmem:[%s3658_s3 + $0x20] sm:$0xff]  }
 0x590   : > { %v575_v21 = vpop.permute.xlu1 %574 }
 0x591   : > { %v951_v28 = vadd.f32 %v2544_v34, %v575_v21  ;;  %v2771_v21 = vld [vmem:[%s3656_s1 + $0xa0] sm:$0xff]  }
 0x592   : > { %2545 = vmatprep.mubr.bf16.mxu0 %v2771_v21  ;;  %v2778_v21 = vld [vmem:[%s3658_s3 + $0x28] sm:$0xff]  }
 0x593   : > { %v1005_v50 = vpack.c.bf16 %v951_v28, %v948_v22  ;;  %v2810_v49 = vpop.eup %2809  ;;  %v2772_v22 = vld [vmem:[%s3656_s1 + $0xa8] sm:$0xff]  }
 0x594   : > { %v425_v47 = vpop.permute.xlu1 %424  ;;  %v1267_v39 = vmul.f32 %v2810_v49, %v2806_v62  ;;  %2546 = vmatmul.mubr.bf16.gmra.mrb[40].mxu0 %v2772_v22  ;;  %v1530_v22 = vsel %vm1026_vm1, %v2778_v21, 0 }
 0x595   : > { %v831_v40 = vadd.f32 %v3104_v54, %v425_v47  ;;  %v892_v54 = vadd.f32 %v3139_v27, %v500_v45  ;;  %v2763_v27 = vld [vmem:[%s3658_s3 + $0x40] sm:$0xff]   ;;  %2617 = vmatprep.mubr.msk.bf16.mxu0 %vm2901_vm0, %v2900_v24 }
 0x597   : > { %v2812_v43 = vpop.eup %2811  ;;  %v990_v44 = vpack.c.bf16 %v831_v40, %v828_v38 }
 0x598   : > { %v435_v42 = vpop.permute.xlu1 %434  ;;  %v1268_v46 = vmul.f32 %v2812_v43, %v2808_v0  ;;  %v1413_v0 = vsel %vm1026_vm1, %v2765_v63, 0  ;;  %v357_v63 = vld [vmem:[%s3657_s2 + $0xe0] sm:$0xff] }
 0x599   : > { %v839_v15 = vadd.f32 %v3102_v53, %v435_v42  ;;  %1579 = vxpose.xlu1.c.b16.start [1/2] (short) (narrow) %v990_v44, 16  ;;  %v900_v53 = vadd.f32 %v3137_v26, %v510_v58  ;;  %v2764_v26 = vld [vmem:[%s3658_s3 + $0x48] sm:$0xff]   ;;  %v343_v58 = vld [vmem:[%s3657_s2 + $0x70] sm:$0xff] }
 0x59a   : > { %v1269_v48 = vpack.c.bf16 %v1268_v46, %v1267_v39 }
 0x59b   : > { %v991_v34 = vpack.c.bf16 %v839_v15, %v836_v37 }
 0x59c   : > { %2692 = vmatprep.subr.msk.bf16.mxu1 %vm1071_vm2, %v1269_v48  ;;  %v505_v25 = vpop.permute.xlu1 %504  ;;  %v1277_v52 = vsel %vm1071_vm2, %v1269_v48, 0 }
 0x59d   : > { %v895_v41 = vadd.f32 %v3146_v30, %v505_v25  ;;  %2576 = vmatpush3.bf16.xpose.msra.mxu1 %v1277_v52  ;;  %1580 = vxpose.xlu1.c.b16.end [2/2] (short) (narrow) %v991_v34, 16  ;;  %v1407_v30 = vsel %vm1026_vm1, %v2763_v27, 0  ;;  %v342_v52 = vld [vmem:[%s3657_s2 + $0x68] sm:$0xff]  ;;  %v372_v27 = vld [vmem:[%s3657_s2 + $0x158] sm:$0xff] }
 0x59e   : > { %2581 = vmatprep.subr.bf16.mxu1 %v2900_v24 }
 0x59f   : > { %v998_v51 = vpack.c.bf16 %v895_v41, %v892_v54  ;;  %v341_v54 = vld [vmem:[%s3657_s2 + $0x60] sm:$0xff]  ;;  %v344_v41 = vld [vmem:[%s3657_s2 + $0x78] sm:$0xff] }
 0x5a0   : > { %v515_v60 = vpop.permute.xlu1 %514 }
 0x5a1   : > { %v903_v61 = vadd.f32 %v3144_v29, %v515_v60  ;;  %v1410_v29 = vsel %vm1026_vm1, %v2764_v26, 0  ;;  %v371_v26 = vld [vmem:[%s3657_s2 + $0x150] sm:$0xff] }
 0x5a3   : > { %v999_v62 = vpack.c.bf16 %v903_v61, %v900_v53  ;;  %v369_v61 = vld [vmem:[%s3657_s2 + $0x140] sm:$0xff] }
 0x5a4   : > { %2578 = vmatmul.mubr.msk.bf16.vlgmr.msra.gmra.mrb[16].mxu1 %vm1071_vm2, %v1005_v50 }
 0x5a5   : > { %2597 = vmatprep.mubr.msk.bf16.mxu1 %vm2901_vm0, %v2900_v24  ;;  %2582 = vmatpush3.bf16.xpose.msra.mxu1 %v1407_v30 }
 0x5a6   : > { %2583 = vmatprep.subr.bf16.mxu1 %v2900_v24 }
 0x5ad   : > { %2584 = vmatpush3.bf16.xpose.msra.mxu1 %v1410_v29  ;;  %v358_v29 = vld [vmem:[%s3657_s2 + $0xe8] sm:$0xff] }
 0x5ae   : > { %2585 = vmatprep.subr.bf16.mxu1 %v2900_v24 }
 0x5b5   : > { %2586 = vmatpush3.bf16.xpose.msra.mxu1 %v1413_v0  ;;  %v359_v0 = vld [vmem:[%s3657_s2 + $0xf0] sm:$0xff] }
 0x5b6   : > { %2587 = vmatprep.subr.bf16.mxu1 %v2900_v24 }
 0x5bd   : > { %2588 = vmatpush3.bf16.xpose.msra.mxu1 %v1416_v2  ;;  %v1515_v2 = vsel %vm1026_vm1, %v2773_v1, 0 }
 0x5be   : > { %2589 = vmatprep.subr.bf16.mxu1 %v2900_v24  ;;  %2602 = vmatpush3.bf16.xpose.msra.mxu0 %v1515_v2 }
 0x5bf   : > { %2603 = vmatprep.subr.bf16.mxu0 %v2900_v24 }
 0x5c5   : > { %2590 = vmatpush3.bf16.xpose.msra.mxu1 %v1419_v4  ;;  %v1518_v4 = vsel %vm1026_vm1, %v2774_v3, 0 }
 0x5c6   : > { %2591 = vmatprep.subr.bf16.mxu1 %v2900_v24  ;;  %2604 = vmatpush3.bf16.xpose.msra.mxu0 %v1518_v4 }
 0x5c7   : > { %2605 = vmatprep.subr.bf16.mxu0 %v2900_v24 }
 0x5cd   : > { %2592 = vmatpush3.bf16.xpose.msra.mxu1 %v1422_v14  ;;  %v1521_v14 = vsel %vm1026_vm1, %v2775_v5, 0 }
 0x5ce   : > { %2593 = vmatprep.subr.bf16.mxu1 %v2900_v24  ;;  %2606 = vmatpush3.bf16.xpose.msra.mxu0 %v1521_v14 }
 0x5cf   : > { %2607 = vmatprep.subr.bf16.mxu0 %v2900_v24 }
 0x5d5   : > { %2594 = vmatpush3.bf16.xpose.msra.mxu1 %v1425_v18  ;;  %v1524_v18 = vsel %vm1026_vm1, %v2776_v17, 0 }
 0x5d6   : > { %2595 = vmatprep.subr.bf16.mxu1 %v2900_v24  ;;  %2608 = vmatpush3.bf16.xpose.msra.mxu0 %v1524_v18 }
 0x5d7   : > { %2609 = vmatprep.subr.bf16.mxu0 %v2900_v24 }
 0x5dd   : > { %2596 = vmatpush3.bf16.xpose.msra.mxu1 %v1428_v20  ;;  %v1527_v20 = vsel %vm1026_vm1, %v2777_v19, 0 }
 0x5de   : > { %2621 = vmatprep.subr.bf16.mxu1 %v2900_v24  ;;  %2610 = vmatpush3.bf16.xpose.msra.mxu0 %v1527_v20 }
 0x5df   : > { %2611 = vmatprep.subr.bf16.mxu0 %v2900_v24 }
 0x5e6   : > { %2612 = vmatpush3.bf16.xpose.msra.mxu0 %v1530_v22 }
 0x5e7   : > { %2613 = vmatprep.subr.bf16.mxu0 %v2900_v24 }
 0x5ff   : > { %v1587_v43 = vpop.trf.xlu1 }
 0x667   : > { %v3361_v60 = vpop.f32.mrb[40].mxu0 }
 0x668   : > { %v3363_v53 = vpop.f32.mrb[41].mxu0 }
 0x677   : > { %v2579_v28 = vpop.f32.mrb[16].mxu1 }
 0x678   : > { %v1313_v32 = vpop.f32.mrb[17].mxu1 }
 0x679   : > { %v2580_v50 = vpop.f32.mrb[18].mxu1 }
 0x67a   : > { %v1329_v47 = vpack.c.bf16 %v2580_v50, %v2579_v28  ;;  %v1316_v49 = vpop.f32.mrb[19].mxu1  ;;  %v2779_v28 = vld [vmem:[%s3658_s3 + $0x30] sm:$0xff]   ;;  %v2780_v50 = vld [vmem:[%s3658_s3 + $0x38] sm:$0xff]  }
 0x67b   : > { %v1328_v38 = vpack.c.bf16 %v1316_v49, %v1313_v32  ;;  %v1533_v32 = vsel %vm1026_vm1, %v2779_v28, 0 }
 0x67c   : > { %2614 = vmatpush3.bf16.xpose.msra.mxu0 %v1533_v32 }
 0x67d   : > { %1330 = vxpose.xlu0.c.b16.start [1/2] (short) (narrow) %v1328_v38, 16  ;;  %2615 = vmatprep.subr.bf16.mxu0 %v2900_v24 }
 0x681   : > { %1331 = vxpose.xlu0.c.b16.end [2/2] (short) (narrow) %v1329_v47, 16 }
 0x6e3   : > { %v1338_v40 = vpop.trf.xlu0 }
 0x6e4   : > { %2598 = vmatmul.mubr.msk.bf16.vlgmr.msra.gmra.mrb[20].mxu1 %vm1026_vm1, %v1338_v40 }
 0x6e5   : > { %2622 = vmatpush3.bf16.msra.mxu1 %v998_v51  ;;  %2625 = vmatprep.mubr.msk.bf16.mxu1 %vm2901_vm0, %v2900_v24  ;;  %v370_v51 = vld [vmem:[%s3657_s2 + $0x148] sm:$0xff] }
 0x6e6   : > { %2623 = vmatprep.subr.bf16.mxu1 %v2900_v24 }
 0x6e9   : > { %2624 = vmatpush3.bf16.msra.mxu1 %v999_v62  ;;  %v3368_v62 = vpop.f32.mrb[42].mxu0 }
 0x6ea   : > { %2635 = vmatprep.subr.bf16.mxu1 %v2900_v24  ;;  %v3373_v30 = vpop.f32.mrb[43].mxu0 }
 0x6ec   : > { %2626 = vmatmul.mubr.msk.bf16.vlgmr.msra.gmra.mrb[24].mxu1 %vm1026_vm1, %v1587_v43 }
 0x6ed   : > { %2651 = vmatprep.mubr.msk.bf16.mxu1 %vm2901_vm0, %v2900_v24 }
 0x7b7   : > { %v3334_v44 = vpop.f32.mrb[20].mxu1 }
 0x7b8   : > { %v2599_v45 = vpop.f32.mrb[21].mxu1 }
 0x7b9   : > { %v3336_v42 = vpop.f32.mrb[22].mxu1  ;;  %v1536_v45 = vsel %vm1026_vm1, %v2780_v50, 0 }
 0x7ba   : > { %v2600_v39 = vpop.f32.mrb[23].mxu1  ;;  %2616 = vmatpush3.bf16.xpose.msra.mxu0 %v1536_v45 }
 0x7bf   : > { %v3338_v46 = vpop.f32.mrb[24].mxu1 }
 0x7c0   : > { %v2627_v37 = vpop.f32.mrb[25].mxu1  ;;  %v1639_v15 = vsel %vm1071_vm2, %v3338_v46, -inf }
 0x7c1   : > { %1640 = vmax.xlane.f32.xlu0 %v1639_v15  ;;  %v3342_v48 = vpop.f32.mrb[26].mxu1 }
 0x7c2   : > { %v2628_v34 = vpop.f32.mrb[27].mxu1  ;;  %v1642_v25 = vsel %vm1071_vm2, %v3342_v48, -inf }
 0x7c3   : > { %1643 = vmax.xlane.f32.xlu1 %v1642_v25 }
 0x7d4   : > { %444 = vperm.xlu1 %2740, %v342_v52  }
 0x7d7   : > { %439 = vperm.xlu0 %2739, %v341_v54  }
 0x7d8   : > { %454 = vperm.xlu1 %2740, %v344_v41  }
 0x7db   : > { %449 = vperm.xlu0 %2739, %v343_v58  }
 0x7dc   : > { %584 = vperm.xlu1 %2740, %v370_v51  }
 0x7df   : > { %579 = vperm.xlu0 %2739, %v369_v61  }
 0x7e0   : > { %594 = vperm.xlu1 %2740, %v372_v27  }
 0x7e3   : > { %589 = vperm.xlu0 %2739, %v371_v26  }
 0x7e4   : > { %524 = vperm.xlu1 %2740, %v358_v29  }
 0x7e7   : > { %519 = vperm.xlu0 %2739, %v357_v63  }
 0x7eb   : > { %529 = vperm.xlu0 %2739, %v359_v0  }
 0x84e   : > { %v1641_v47 = vpop.xlane.xlu0 %1640 }
 0x84f   : > { %v1645_v49 = vsub.f32 %v3338_v46, %v1641_v47 }
 0x850   : > { %v1644_v38 = vpop.xlane.xlu1 %1643 }
 0x851   : > { %v1647_v40 = vmul.f32 1.442695, %v1645_v49  ;;  %v1646_v43 = vsub.f32 %v3342_v48, %v1644_v38 }
 0x853   : > { %2813 = vpow2.f32 %v1647_v40  ;;  %v1649_v39 = vmul.f32 1.442695, %v1646_v43 }
 0x854   : > { %v445_v37 = vpop.permute.xlu1 %444 }
 0x855   : > { %2815 = vpow2.f32 %v1649_v39  ;;  %v847_v34 = vadd.f32 %v3112_v59, %v445_v37 }
 0x856   : > { %v440_v15 = vpop.permute.xlu0 %439 }
 0x857   : > { %v844_v25 = vadd.f32 %v3108_v56, %v440_v15 }
 0x858   : > { %v455_v52 = vpop.permute.xlu1 %454 }
 0x859   : > { %v992_v54 = vpack.c.bf16 %v847_v34, %v844_v25  ;;  %v855_v46 = vadd.f32 %v3110_v57, %v455_v52  ;;  %v373_v52 = vld [vmem:[%s3657_s2 + $0x160] sm:$0xff] }
 0x85a   : > { %v450_v41 = vpop.permute.xlu0 %449 }
 0x85b   : > { %v852_v58 = vadd.f32 %v3106_v55, %v450_v41  ;;  %v376_v41 = vld [vmem:[%s3657_s2 + $0x178] sm:$0xff] }
 0x85c   : > { %v585_v48 = vpop.permute.xlu1 %584 }
 0x85d   : > { %v2814_v51 = vpop.eup %2813  ;;  %v993_v61 = vpack.c.bf16 %v855_v46, %v852_v58  ;;  %v959_v63 = vadd.f32 %v3373_v30, %v585_v48  ;;  %v2781_v46 = vld [vmem:[%s3658_s3 + $0x80] sm:$0xff]   ;;  %v2782_v48 = vld [vmem:[%s3658_s3 + $0x88] sm:$0xff]  }
 0x85e   : > { %v580_v27 = vpop.permute.xlu0 %579  ;;  %v1651_v26 = vsel %vm1071_vm2, %v2814_v51, 0.0  ;;  %v1799_v58 = vsel %vm1026_vm1, %v2781_v46, 0 }
 0x85f   : > { %v2816_v29 = vpop.eup %2815  ;;  %v956_v59 = vadd.f32 %v3363_v53, %v580_v27  ;;  %1652 = vadd.xlane.f32.xlu0 %v1651_v26  ;;  %v360_v53 = vld [vmem:[%s3657_s2 + $0xf8] sm:$0xff]  ;;  %2636 = vmatpush3.bf16.xpose.msra.mxu1 %v1799_v58 }
 0x860   : > { %v595_v56 = vpop.permute.xlu1 %594  ;;  %v1654_v0 = vsel %vm1071_vm2, %v2816_v29, 0.0  ;;  %2637 = vmatprep.subr.bf16.mxu1 %v2900_v24  ;;  %v2784_v26 = vld [vmem:[%s3658_s3 + $0x98] sm:$0xff]  }
 0x861   : > { %v1006_v1 = vpack.c.bf16 %v959_v63, %v956_v59  ;;  %1655 = vadd.xlane.f32.xlu1 %v1654_v0  ;;  %v967_v55 = vadd.f32 %v3368_v62, %v595_v56  ;;  %v2785_v63 = vld [vmem:[%s3658_s3 + $0xa0] sm:$0xff]   ;;  %v2786_v56 = vld [vmem:[%s3658_s3 + $0xa8] sm:$0xff]  }
 0x862   : > { %v590_v57 = vpop.permute.xlu0 %589  ;;  %v1811_v59 = vsel %vm1026_vm1, %v2785_v63, 0  ;;  %v1814_v0 = vsel %vm1026_vm1, %v2786_v56, 0 }
 0x863   : > { %v964_v2 = vadd.f32 %v3361_v60, %v590_v57 }
 0x864   : > { %v525_v3 = vpop.permute.xlu1 %524 }
 0x865   : > { %v1007_v4 = vpack.c.bf16 %v967_v55, %v964_v2  ;;  %v911_v14 = vadd.f32 %v3160_v36, %v525_v3 }
 0x866   : > { %v520_v5 = vpop.permute.xlu0 %519 }
 0x867   : > { %v908_v30 = vadd.f32 %v3153_v33, %v520_v5 }
 0x869   : > { %v1000_v17 = vpack.c.bf16 %v911_v14, %v908_v30 }
 0x86a   : > { %v530_v60 = vpop.permute.xlu0 %529 }
 0x86b   : > { %v916_v19 = vadd.f32 %v3148_v31, %v530_v60 }
 0x872   : > { %534 = vperm.xlu1 %2740, %v360_v53  }
 0x88c   : > { %1155 = vxpose.xlu0.c.b16.start [1/2] (short) (narrow) %v1153_v16, 16 }
 0x890   : > { %1156 = vxpose.xlu0.c.b16.end [2/2] (short) (narrow) %v1154_v8, 16 }
 0x895   : > { %1865 = vxpose.xlu1.c.b16.start [1/2] (short) (narrow) %v992_v54, 16  ;;  %v375_v54 = vld [vmem:[%s3657_s2 + $0x170] sm:$0xff] }
 0x899   : > { %1866 = vxpose.xlu1.c.b16.end [2/2] (short) (narrow) %v993_v61, 16  ;;  %v2783_v61 = vld [vmem:[%s3658_s3 + $0x90] sm:$0xff]  }
 0x89a   : > { %v1805_v27 = vsel %vm1026_vm1, %v2783_v61, 0 }
 0x8ec   : > { %v1653_v36 = vpop.xlane.xlu0 %1652 }
 0x8ed   : > { %2817 = vrcp.f32 %v1653_v36 }
 0x8ee   : > { %v1656_v33 = vpop.xlane.xlu1 %1655 }
 0x8ef   : > { %2819 = vrcp.f32 %v1656_v33 }
 0x8f2   : > { %v535_v62 = vpop.permute.xlu1 %534  ;;  %v1163_v18 = vpop.trf.xlu0 }
 0x8f3   : > { %v919_v20 = vadd.f32 %v3158_v35, %v535_v62  ;;  %2618 = vmatmul.mubr.msk.bf16.vlgmr.msra.gmra.mrb[44].mxu0 %vm1026_vm1, %v1163_v18 }
 0x8f4   : > { %2631 = vmatprep.mubr.msk.bf16.mxu0 %vm1071_vm2, %v1006_v1 }
 0x8f5   : > { %v1001_v6 = vpack.c.bf16 %v919_v20, %v916_v19  ;;  %v2787_v19 = vld [vmem:[%s3658_s3 + $0xb0] sm:$0xff]  }
 0x8f6   : > { %v1817_v20 = vsel %vm1026_vm1, %v2787_v19, 0 }
 0x8f7   : > { %v2818_v23 = vpop.eup %2817 }
 0x8f8   : > { %v1659_v8 = vmul.f32 %v2818_v23, %v2814_v51  ;;  %v1802_v51 = vsel %vm1026_vm1, %v2782_v48, 0 }
 0x8f9   : > { %v2820_v7 = vpop.eup %2819  ;;  %2638 = vmatpush3.bf16.xpose.msra.mxu1 %v1802_v51 }
 0x8fa   : > { %v1660_v9 = vmul.f32 %v2820_v7, %v2816_v29  ;;  %2639 = vmatprep.subr.bf16.mxu1 %v2900_v24  ;;  %v1808_v29 = vsel %vm1026_vm1, %v2784_v26, 0 }
 0x8fb   : > { %v1873_v31 = vpop.trf.xlu1 }
 0x8fc   : > { %v1661_v16 = vpack.c.bf16 %v1660_v9, %v1659_v8 }
 0x8fe   : > { %2693 = vmatprep.subr.msk.bf16.mxu0 %vm1071_vm2, %v1661_v16  ;;  %v1669_v21 = vsel %vm1071_vm2, %v1661_v16, 0 }
 0x8ff   : > { %2630 = vmatpush3.bf16.xpose.msra.mxu0 %v1669_v21 }
 0x900   : > { %2655 = vmatprep.subr.bf16.mxu0 %v2900_v24 }
 0x901   : > { %2640 = vmatpush3.bf16.xpose.msra.mxu1 %v1805_v27 }
 0x902   : > { %2641 = vmatprep.subr.bf16.mxu1 %v2900_v24 }
 0x906   : > { %2632 = vmatmul.mubr.msk.bf16.vlgmr.msra.gmra.mrb[48].mxu0 %vm1071_vm2, %v1007_v4 }
 0x907   : > { %2656 = vmatpush3.bf16.msra.mxu0 %v1000_v17  ;;  %2659 = vmatprep.mubr.msk.bf16.mxu0 %vm2901_vm0, %v2900_v24 }
 0x908   : > { %2657 = vmatprep.subr.bf16.mxu0 %v2900_v24 }
 0x909   : > { %2642 = vmatpush3.bf16.xpose.msra.mxu1 %v1808_v29 }
 0x90a   : > { %2643 = vmatprep.subr.bf16.mxu1 %v2900_v24 }
 0x90b   : > { %2658 = vmatpush3.bf16.msra.mxu0 %v1001_v6  ;;  %v374_v6 = vld [vmem:[%s3657_s2 + $0x168] sm:$0xff] }
 0x90e   : > { %2660 = vmatmul.mubr.msk.bf16.vlgmr.msra.gmra.mrb[52].mxu0 %vm1026_vm1, %v1873_v31 }
 0x911   : > { %2644 = vmatpush3.bf16.xpose.msra.mxu1 %v1811_v59 }
 0x912   : > { %2645 = vmatprep.subr.bf16.mxu1 %v2900_v24 }
 0x919   : > { %2646 = vmatpush3.bf16.xpose.msra.mxu1 %v1814_v0 }
 0x91a   : > { %2647 = vmatprep.subr.bf16.mxu1 %v2900_v24 }
 0x921   : > { %2648 = vmatpush3.bf16.xpose.msra.mxu1 %v1817_v20 }
 0x922   : > { %2649 = vmatprep.subr.bf16.mxu1 %v2900_v24 }
 0x9c6   : > { %v1572_v35 = vpop.f32.mrb[44].mxu0 }
 0x9c7   : > { %v3462_v22 = vadd.f32 %v1572_v35, %v3334_v44  ;;  %v2619_v28 = vpop.f32.mrb[45].mxu0 }
 0x9c8   : > { %v1575_v32 = vpop.f32.mrb[46].mxu0 }
 0x9c9   : > { %v3465_v50 = vadd.f32 %v1575_v32, %v3336_v42  ;;  %v2620_v47 = vpop.f32.mrb[47].mxu0 }
 0x9d9   : > { %v3467_v49 = vpop.f32.mrb[48].mxu0 }
 0x9da   : > { %v3469_v38 = vpop.f32.mrb[49].mxu0 }
 0x9db   : > { %v3471_v40 = vpop.f32.mrb[50].mxu0 }
 0x9dc   : > { %v1721_v43 = vpack.c.bf16 %v3471_v40, %v3467_v49  ;;  %v3475_v45 = vpop.f32.mrb[51].mxu0  ;;  %v2790_v40 = vld [vmem:[%s3658_s3 + $0xc8] sm:$0xff]  }
 0x9dd   : > { %v1720_v44 = vpack.c.bf16 %v3475_v45, %v3469_v38  ;;  %v2791_v45 = vld [vmem:[%s3658_s3 + $0xd0] sm:$0xff]  }
 0x9e1   : > { %v1918_v39 = vpop.f32.mrb[52].mxu0 }
 0x9e2   : > { %v2661_v37 = vpop.f32.mrb[53].mxu0  ;;  %v1925_v42 = vsel %vm1071_vm2, %v1918_v39, -inf }
 0x9e3   : > { %1926 = vmax.xlane.f32.xlu0 %v1925_v42  ;;  %v1921_v15 = vpop.f32.mrb[54].mxu0  ;;  %v2793_v42 = vld [vmem:[%s3658_s3 + $0xe0] sm:$0xff]  }
 0x9e4   : > { %v2662_v34 = vpop.f32.mrb[55].mxu0  ;;  %v1928_v25 = vsel %vm1071_vm2, %v1921_v15, -inf }
 0x9e5   : > { %1929 = vmax.xlane.f32.xlu1 %v1928_v25  ;;  %v2794_v34 = vld [vmem:[%s3658_s3 + $0xe8] sm:$0xff]  }
 0x9e6   : > { %v2100_v25 = vsel %vm1026_vm1, %v2794_v34, 0 }
 0x9f6   : > { %599 = vperm.xlu1 %2740, %v373_v52   ;;  %v2795_v52 = vld [vmem:[%s3658_s3 + $0xf0] sm:$0xff]  }
 0x9fa   : > { %609 = vperm.xlu1 %2740, %v375_v54   ;;  %v2103_v54 = vsel %vm1026_vm1, %v2795_v52, 0 }
 0x9fe   : > { %614 = vperm.xlu1 %2740, %v376_v41   ;;  %v2796_v41 = vld [vmem:[%s3658_s3 + $0xf8] sm:$0xff]  }
 0x9ff   : > { %v2106_v46 = vsel %vm1026_vm1, %v2796_v41, 0 }
 0xa70   : > { %v1927_v1 = vpop.xlane.xlu0 %1926 }
 0xa71   : > { %v1931_v57 = vsub.f32 %v1918_v39, %v1927_v1  ;;  %v2792_v39 = vld [vmem:[%s3658_s3 + $0xd8] sm:$0xff]  }
 0xa72   : > { %v1930_v55 = vpop.xlane.xlu1 %1929  ;;  %v2094_v37 = vsel %vm1026_vm1, %v2792_v39, 0 }
 0xa73   : > { %v1933_v2 = vmul.f32 1.442695, %v1931_v57  ;;  %v1932_v3 = vsub.f32 %v1921_v15, %v1930_v55  ;;  %v2097_v15 = vsel %vm1026_vm1, %v2793_v42, 0 }
 0xa75   : > { %2821 = vpow2.f32 %v1933_v2  ;;  %v1935_v4 = vmul.f32 1.442695, %v1932_v3 }
 0xa76   : > { %v600_v5 = vpop.permute.xlu1 %599 }
 0xa77   : > { %2823 = vpow2.f32 %v1935_v4  ;;  %v972_v16 = vadd.f32 %v3118_v11, %v600_v5  ;;  %v2789_v11 = vld [vmem:[%s3658_s3 + $0xc0] sm:$0xff]  }
 0xa7a   : > { %v610_v14 = vpop.permute.xlu1 %609 }
 0xa7b   : > { %v980_v53 = vadd.f32 %v3116_v10, %v610_v14  ;;  %v2788_v10 = vld [vmem:[%s3658_s3 + $0xb8] sm:$0xff]  }
 0xa7e   : > { %v615_v30 = vpop.permute.xlu1 %614 }
 0xa7f   : > { %v2822_v17 = vpop.eup %2821  ;;  %v983_v60 = vadd.f32 %v3120_v12, %v615_v30  ;;  %v1820_v12 = vsel %vm1026_vm1, %v2788_v10, 0  ;;  %v2833_v30 = vld [vmem:[%s3001_s19] sm:$0xff] }
 0xa80   : > { %v1937_v36 = vsel %vm1071_vm2, %v2822_v17, 0.0  ;;  %2650 = vmatpush3.bf16.xpose.msra.mxu1 %v1820_v12 }
 0xa81   : > { %v2824_v33 = vpop.eup %2823  ;;  %v1009_v62 = vpack.c.bf16 %v983_v60, %v980_v53  ;;  %1938 = vadd.xlane.f32.xlu0 %v1937_v36  ;;  %v2834_v53 = vld [vmem:[%s3001_s19 + $0x8] sm:$0xff]  ;;  %s269_s19 = sand.u32 1, %s2889_s25  }
 0xa82   : > { %v1940_v18 = vsel %vm1071_vm2, %v2824_v33, 0.0  ;;  %s2285_s22 = sshll.u32 %s269_s19, 4  ;;  %s3614_s17 = scalar_lea.sflag [#allocation3], %s269_s19 }
 0xa83   : > { %s271_s9 = scalar_lea.vmem [#allocation2], %s2285_s22 }
 0xa84   : > { %s2219_s13 = sshll.u32 %s271_s9, 4  ;;  %s3612_s13 = int_to_ptr.vmem [resolvable:$true] %s2219_s13 }
 0xa85   : > { %1941 = vadd.xlane.f32.xlu0 %v1940_v18  ;;  %s2835_s18 = scalar_lea.vmem %s3612_s13, 256  ;;  %p2842_p0 = scmp.lt.s32.totalorder %s3612_s13, %s2840_s20 }
 0xa86   : > { %p2836_p11 = scmp.ne.s32.totalorder %s3612_s13, %s2835_s18  ;;  %p2843_p1 = scmp.lt.s32.totalorder %s2841_s21, %s2835_s18 }
 0xa88   : > { %p2837_p12 = pnand %p2836_p11, %p2983_p5  ;;  %p2844_p2 = por %p2843_p1, %p2842_p0 }
 0xa8a   : > { %p2838_p13 = pneg %p2837_p12 }
 0xa8c   : > { %p2845_p3 = pnand %p2844_p2, %p2838_p13 }
 0xa9b   : > { %604 = vperm.xlu0 %2739, %v374_v6  }
 0xab9   : > { %1722 = vxpose.xlu0.c.b16.start [1/2] (short) (narrow) %v1720_v44, 16  ;;  %v2091_v44 = vsel %vm1026_vm1, %v2791_v45, 0 }
 0xabd   : > { %1723 = vxpose.xlu0.c.b16.end [2/2] (short) (narrow) %v1721_v43, 16  ;;  %v2088_v43 = vsel %vm1026_vm1, %v2790_v40, 0 }
 0xb0e   : > { %v1939_v23 = vpop.xlane.xlu0 %1938 }
 0xb0f   : > { %2825 = vrcp.f32 %v1939_v23 }
 0xb12   : > { %v1942_v7 = vpop.xlane.xlu0 %1941 }
 0xb13   : > { %2827 = vrcp.f32 %v1942_v7 }
 0xb19   : > { %v2826_v9 = vpop.eup %2825 }
 0xb1a   : > { %v605_v8 = vpop.permute.xlu0 %604  ;;  %v1945_v28 = vmul.f32 %v2826_v9, %v2822_v17 }
 0xb1b   : > { %v975_v21 = vadd.f32 %v3122_v13, %v605_v8  ;;  %v2085_v13 = vsel %vm1026_vm1, %v2789_v11, 0 }
 0xb1d   : > { %v2828_v31 = vpop.eup %2827  ;;  %v1008_v35 = vpack.c.bf16 %v975_v21, %v972_v16 }
 0xb1e   : > { %v1946_v32 = vmul.f32 %v2828_v31, %v2824_v33  ;;  %v2409_v31 = vld [vmem:[%s3660_s5] ss:$0 sm:$0xff] }
 0xb1f   : > { %2665 = vmatprep.mubr.msk.bf16.mxu0 %vm1071_vm2, %v1008_v35  ;;  %v1730_v47 = vpop.trf.xlu0 }
 0xb20   : > { %2652 = vmatmul.mubr.msk.bf16.vlgmr.msra.gmra.mrb[28].mxu1 %vm1026_vm1, %v1730_v47  ;;  %v1947_v49 = vpack.c.bf16 %v1946_v32, %v1945_v28  ;;  %v2410_v28 = vld [vmem:[%s3661_s6] ss:$0 sm:$0xff] }
 0xb22   : > { %2694 = vmatprep.subr.msk.bf16.mxu0 %vm1071_vm2, %v1947_v49  ;;  %v1955_v38 = vsel %vm1071_vm2, %v1947_v49, 0 }
 0xb23   : > { %2664 = vmatpush3.bf16.xpose.msra.mxu0 %v1955_v38 }
 0xb24   : > { %2669 = vmatprep.subr.bf16.mxu0 %v2900_v24 }
 0xb2a   : > { %2666 = vmatmul.mubr.msk.bf16.vlgmr.msra.gmra.mrb[56].mxu0 %vm1071_vm2, %v1009_v62 }
 0xb2b   : > { %2685 = vmatprep.mubr.msk.bf16.mxu0 %vm2901_vm0, %v2900_v24  ;;  %2670 = vmatpush3.bf16.xpose.msra.mxu0 %v2085_v13 }
 0xb2c   : > { %2671 = vmatprep.subr.bf16.mxu0 %v2900_v24 }
 0xb33   : > { %2672 = vmatpush3.bf16.xpose.msra.mxu0 %v2088_v43 }
 0xb34   : > { %2673 = vmatprep.subr.bf16.mxu0 %v2900_v24 }
 0xb3b   : > { %2674 = vmatpush3.bf16.xpose.msra.mxu0 %v2091_v44 }
 0xb3c   : > { %2675 = vmatprep.subr.bf16.mxu0 %v2900_v24 }
 0xb43   : > { %2676 = vmatpush3.bf16.xpose.msra.mxu0 %v2094_v37 }
 0xb44   : > { %2677 = vmatprep.subr.bf16.mxu0 %v2900_v24 }
 0xb4b   : > { %2678 = vmatpush3.bf16.xpose.msra.mxu0 %v2097_v15 }
 0xb4c   : > { %2679 = vmatprep.subr.bf16.mxu0 %v2900_v24 }
 0xb53   : > { %2680 = vmatpush3.bf16.xpose.msra.mxu0 %v2100_v25 }
 0xb54   : > { %2681 = vmatprep.subr.bf16.mxu0 %v2900_v24 }
 0xb5b   : > { %2682 = vmatpush3.bf16.xpose.msra.mxu0 %v2103_v54 }
 0xb5c   : > { %2683 = vmatprep.subr.bf16.mxu0 %v2900_v24 }
 0xb63   : > { %2684 = vmatpush3.bf16.xpose.msra.mxu0 %v2106_v46 }
 0xbf3   : > { %v1856_v58 = vpop.f32.mrb[28].mxu1 }
 0xbf4   : > { %v1863_v48 = vadd.f32 %v1856_v58, %v3462_v22  ;;  %v2653_v51 = vpop.f32.mrb[29].mxu1  ;;  %v2408_v22 = vld [vmem:[%s3659_s4] ss:$0 sm:$0xff] }
 0xbf5   : > { %v1859_v61 = vpop.f32.mrb[30].mxu1 }
 0xbf6   : > { %v1864_v27 = vadd.f32 %v1859_v61, %v3465_v50  ;;  %v2654_v26 = vpop.f32.mrb[31].mxu1 }
 0xbfd   : > { %v2667_v29 = vpop.f32.mrb[56].mxu0 }
 0xbfe   : > { %v1991_v63 = vpop.f32.mrb[57].mxu0 }
 0xbff   : > { %v2668_v59 = vpop.f32.mrb[58].mxu0 }
 0xc00   : > { %v2007_v56 = vpack.c.bf16 %v2668_v59, %v2667_v29  ;;  %v1994_v24 = vpop.f32.mrb[59].mxu0 }
 0xc01   : > { %v2006_v0 = vpack.c.bf16 %v1994_v24, %v1991_v63 }
 0xc03   : > { %2008 = vxpose.xlu1.c.b16.start [1/2] (short) (narrow) %v2006_v0, 16 }
 0xc07   : > { %2009 = vxpose.xlu1.c.b16.end [2/2] (short) (narrow) %v2007_v56, 16 }
 0xc69   : > { %v2016_v1 = vpop.trf.xlu1 }
 0xc6a   : > { %2686 = vmatmul.mubr.msk.bf16.vlgmr.msra.gmra.mrb[60].mxu0 %vm1026_vm1, %v2016_v1 }
 0xd3d   : > { %v2142_v57 = vpop.f32.mrb[60].mxu0 }
 0xd3e   : > { %v2149_v50 = vadd.f32 %v2142_v57, %v1863_v48  ;;  %v2687_v55 = vpop.f32.mrb[61].mxu0 }
 0xd3f   : > { %v2145_v2 = vpop.f32.mrb[62].mxu0 }
 0xd40   : > { %v2158_v3 = vadd.f32 %v2408_v22, %v2149_v50  ;;  %v2150_v4 = vadd.f32 %v2145_v2, %v1864_v27  ;;  %v2688_v5 = vpop.f32.mrb[63].mxu0 }
 0xd42   : > { %v2159_v14 = vadd.f32 %v2408_v22, %v2150_v4  ;;  %v2160_v17 = vadd.f32 %v2833_v30, %v2158_v3 }
 0xd44   : > { %2164 = vadd.xlane.f32.xlu0 %v2160_v17  ;;  %v2161_v60 = vadd.f32 %v2834_v53, %v2159_v14 }
 0xd46   : > { %2166 = vadd.xlane.f32.xlu1 %v2161_v60 }
 0xdd1   : > { %v2165_v36 = vpop.xlane.xlu0 %2164 }
 0xdd2   : > { %v2169_v33 = vmul.f32 0.0078125, %v2165_v36 }
 0xdd3   : > { %v2167_v62 = vpop.xlane.xlu1 %2166 }
 0xdd4   : > { %v2171_v18 = vsub.f32 %v2160_v17, %v2169_v33  ;;  %v2170_v19 = vmul.f32 0.0078125, %v2167_v62 }
 0xdd6   : > { %v2172_v20 = vsub.f32 %v2161_v60, %v2170_v19  ;;  %v2173_v10 = vmul.f32 %v2171_v18, %v2171_v18 }
 0xdd8   : > { %2175 = vadd.xlane.f32.xlu0 %v2173_v10  ;;  %v2174_v12 = vmul.f32 %v2172_v20, %v2172_v20 }
 0xddc   : > { %2177 = vadd.xlane.f32.xlu0 %v2174_v12 }
 0xe65   : > { %v2176_v6 = vpop.xlane.xlu0 %2175 }
 0xe66   : > { %v2179_v23 = vmul.f32 0.0078125, %v2176_v6 }
 0xe68   : > { %v2181_v7 = vadd.f32 1e-05, %v2179_v23 }
 0xe69   : > { %v2178_v8 = vpop.xlane.xlu0 %2177 }
 0xe6a   : > { %2829 = vrsqrt.f32 %v2181_v7  ;;  %v2180_v9 = vmul.f32 0.0078125, %v2178_v8 }
 0xe6c   : > { %v2182_v16 = vadd.f32 1e-05, %v2180_v9 }
 0xe6e   : > { %2831 = vrsqrt.f32 %v2182_v16 }
 0xe74   : > { %v2830_v21 = vpop.eup %2829 }
 0xe75   : > { %v2185_v35 = vmul.f32 %v2830_v21, %v2171_v18 }
 0xe77   : > { %v2193_v32 = vmul.f32 %v2409_v31, %v2185_v35 }
 0xe78   : > { %v2832_v47 = vpop.eup %2831 }
 0xe79   : > { %v2186_v49 = vmul.f32 %v2832_v47, %v2172_v20  ;;  %v2201_v38 = vadd.f32 %v2410_v28, %v2193_v32 }
 0xe7b   : > { %v2194_v11 = vmul.f32 %v2409_v31, %v2186_v49  ;;  %2203 = vst [vmem:[%s271_s9] sm:$0xff] %v2201_v38 }
 0xe7d   : > { %v2202_v13 = vadd.f32 %v2410_v28, %v2194_v11 }
 0xe7f   : > { %2204 = vst [vmem:[%s271_s9 + $0x8] sm:$0xff] %v2202_v13 }
 0xe80   : > { %2848 = shalt.err (!%p2845_p3)
}
 0xe81   : > { %s2849_s19 = scalar_lea.hbm %s3610_s16, 256  ;;  %s2853_s29 = scalar_lea.hbm %s3662_s7, 512 }
 0xe82   : > { %p2850_p4 = scmp.ne.s32.totalorder %s3610_s16, %s2849_s19  ;;  %p2854_p9 = scmp.lt.u32.totalorder %s3610_s16, %s3662_s7 }
 0xe83   : > { %p2855_p10 = scmp.lt.u32.totalorder %s2853_s29, %s2849_s19  ;;  %p2857_p12 = scmp.lt.u32.totalorder %s2849_s19, %s3610_s16 }
 0xe84   : > { %p2851_p7 = pnand %p2850_p4, %p2983_p5 }
 0xe85   : > { %p2856_p11 = por %p2855_p10, %p2854_p9 }
 0xe86   : > { %p2852_p8 = pneg %p2851_p7 }
 0xe87   : > { %p2858_p13 = por %p2857_p12, %p2856_p11 }
 0xe89   : > { %p2859_p0 = pnand %p2858_p13, %p2852_p8 }
 0xe8b   : > { %2862 = shalt.err (!%p2859_p0)
}
 0xe8c   : > { %s2903_s14 = smov 128   ;;  %s2904_s15 = smov 8  }
 0xe8d   : > { %2695 = dma.vmem_to_hbm [thread:$0]  (%p2983_p5), %s3612_s13, 256, %s3610_s16, %s3614_s17, %s2903_s14, %s2903_s14, %s2904_s15  }
 0xe8e PF: > { %p2701_p1 = scmp.ge.s32.totalorder %s2897_s27, 2  ;;  %s2234_s18 = sand.u32 1, %s2885_s24  }
 0xe8f   : > { %s2235_s28 = scalar_lea.sflag [#allocation3], %s2234_s18 }
 0xe90   : > { %p2698_p2 = pnand %p2701_p1, %p2987_p6 }
 0xe92   : > { %2880 = dma.done.wait (!%p2698_p2), %s2235_s28, 256  }
 0xe93   : > { %2882 = vsyncadd (!%p2698_p2), %s2235_s28, 4294967040  ;;  %p17_p3 = scmp.ge.s32.totalorder %s2970_s30, 4   ;;  %s3665_s24 = smov %s2889_s25 }
 0xe94   : > { %s3666_s25 = smov %s2893_s26  ;;  %s3667_s26 = smov %s2981_s10 }
 0xe95   : > { %s3668_s27 = smov %s2970_s30  ;;  %19 = sbr.rel (!%p17_p3) target bundleno = 3 (0x3), region = 86 }
 0xe9c   :  { %2240 = vsyncpa [#allocation3], 1 }
 0xe9d   :  { %2242 = vsyncpa [#allocation3 + $0x1], 1 }

</bundles_post_ra>
